<compile_context>
chip_gen: v7x
topology: tpu7x:2x2x1
jax: 0.10.0
libtpu: 0.0.40
codegen_flags: <defaults>
</compile_context>

<pallas_src>
import functools
import math

import jax
import jax.numpy as jnp
from jax.experimental import pallas as pl
from jax.experimental.pallas import tpu as pltpu


# ------------------------------ tiling helper ------------------------------ #

def _pick_tile(dim, pref, align):
    """Largest multiple of `align` that divides `dim` and is <= pref; else full dim."""
    if dim <= pref:
        return dim
    t = (pref // align) * align
    while t >= align:
        if dim % t == 0:
            return t
        t -= align
    return dim


# ------------------------- tiled linear (+bias, relu) ----------------------- #

def _matmul_kernel(x_ref, w_ref, b_ref, o_ref, acc_ref, *, relu):
    @pl.when(pl.program_id(2) == 0)
    def _():
        acc_ref[...] = jnp.zeros_like(acc_ref)

    acc_ref[...] += jnp.dot(x_ref[...], w_ref[...],
                            preferred_element_type=jnp.float32)

    @pl.when(pl.program_id(2) == pl.num_programs(2) - 1)
    def _():
        y = acc_ref[...] + b_ref[...]
        if relu:
            y = jnp.maximum(y, 0.0)
        o_ref[...] = y.astype(o_ref.dtype)


def pallas_linear(x2d, w, b, relu=False, tm=256, tn=256, tk=512):
    """x2d: (M, K), w: (K, N) pre-transposed, b: (N,) -> x2d @ w + b (opt. relu)."""
    M, K = x2d.shape
    N = w.shape[1]
    tm = _pick_tile(M, tm, 8)
    tn = _pick_tile(N, tn, 128)
    tk = _pick_tile(K, tk, 128)
    grid = (M // tm, N // tn, K // tk)
    return pl.pallas_call(
        functools.partial(_matmul_kernel, relu=relu),
        out_shape=jax.ShapeDtypeStruct((M, N), jnp.float32),
        grid=grid,
        in_specs=[pl.BlockSpec((tm, tk), lambda i, j, k: (i, k)),
                  pl.BlockSpec((tk, tn), lambda i, j, k: (k, j)),
                  pl.BlockSpec((1, tn), lambda i, j, k: (0, j))],
        out_specs=pl.BlockSpec((tm, tn), lambda i, j, k: (i, j)),
        scratch_shapes=[pltpu.VMEM((tm, tn), jnp.float32)],
        compiler_params=pltpu.CompilerParams(
            dimension_semantics=("parallel", "parallel", "arbitrary")),
    )(x2d, w, b.reshape(1, N))


# -------------------- row-tiled LayerNorm (opt. +residual) ------------------ #

def _layernorm_kernel(*refs, has_residual):
    if has_residual:
        x_ref, r_ref, g_ref, b_ref, o_ref = refs
        x = x_ref[...].astype(jnp.float32) + r_ref[...].astype(jnp.float32)
    else:
        x_ref, g_ref, b_ref, o_ref = refs
        x = x_ref[...].astype(jnp.float32)
    mu = jnp.mean(x, axis=-1, keepdims=True)
    var = jnp.mean(jnp.square(x - mu), axis=-1, keepdims=True)
    y = (x - mu) * jax.lax.rsqrt(var + 1e-5)  # PyTorch LayerNorm default eps
    o_ref[...] = (y * g_ref[...] + b_ref[...]).astype(o_ref.dtype)


def pallas_layernorm(x2d, gamma, beta, residual=None, tm=512):
    """LayerNorm(x2d [+ residual]) over the last axis, row-tiled."""
    M, D = x2d.shape
    tm = _pick_tile(M, tm, 8)
    has_res = residual is not None

    in_specs = [pl.BlockSpec((tm, D), lambda i: (i, 0))]
    args = [x2d]
    if has_res:
        in_specs.append(pl.BlockSpec((tm, D), lambda i: (i, 0)))
        args.append(residual)
    in_specs += [pl.BlockSpec((1, D), lambda i: (0, 0)),
                 pl.BlockSpec((1, D), lambda i: (0, 0))]
    args += [gamma.reshape(1, D), beta.reshape(1, D)]

    return pl.pallas_call(
        functools.partial(_layernorm_kernel, has_residual=has_res),
        out_shape=jax.ShapeDtypeStruct((M, D), jnp.float32),
        grid=(M // tm,),
        in_specs=in_specs,
        out_specs=pl.BlockSpec((tm, D), lambda i: (i, 0)),
        compiler_params=pltpu.CompilerParams(dimension_semantics=("parallel",)),
    )(*args)


# ----------------- flash-style multi-head attention kernel ------------------ #

def _attn_kernel(*refs, scale, has_mask, has_kpm):
    idx = 0
    q_ref = refs[idx]; idx += 1
    k_ref = refs[idx]; idx += 1
    v_ref = refs[idx]; idx += 1
    mask_ref = None
    kpm_ref = None
    if has_mask:
        mask_ref = refs[idx]; idx += 1
    if has_kpm:
        kpm_ref = refs[idx]; idx += 1
    o_ref = refs[idx]; idx += 1
    m_sc, l_sc, acc_sc = refs[idx], refs[idx + 1], refs[idx + 2]

    kv = pl.program_id(1)

    @pl.when(kv == 0)
    def _():
        m_sc[...] = jnp.full_like(m_sc, -jnp.inf)
        l_sc[...] = jnp.zeros_like(l_sc)
        acc_sc[...] = jnp.zeros_like(acc_sc)

    q = q_ref[0]                                   # (H, Lq, dh)
    k = k_ref[0]                                   # (H, tk, dh)
    v = v_ref[0]                                   # (H, tk, dh)

    # Batched-over-heads QK^T; dot_general contracts the last dims directly.
    s = jnp.einsum("hqd,hkd->hqk", q, k,
                   preferred_element_type=jnp.float32) * scale   # (H, Lq, tk)
    if has_mask:
        s = s + mask_ref[...][None, :, :]          # (Lq, tk) broadcast over heads
    if has_kpm:
        s = s + kpm_ref[0][None, :, :]             # (1, tk) broadcast over H, Lq

    m_prev = m_sc[...]                             # (H, Lq, 1)
    m_new = jnp.maximum(m_prev, jnp.max(s, axis=-1, keepdims=True))
    alpha = jnp.exp(m_prev - m_new)
    p = jnp.exp(s - m_new)
    l_sc[...] = alpha * l_sc[...] + jnp.sum(p, axis=-1, keepdims=True)
    acc_sc[...] = alpha * acc_sc[...] + jnp.einsum(
        "hqk,hkd->hqd", p, v, preferred_element_type=jnp.float32)
    m_sc[...] = m_new

    @pl.when(kv == pl.num_programs(1) - 1)
    def _():
        o_ref[0] = (acc_sc[...] *
                    pl.reciprocal(l_sc[...], approx=True)).astype(o_ref.dtype)


def pallas_attention(q, k, v, attn_mask, key_padding_mask, scale, tk=512):
    """q: (B,H,Lq,dh), k/v: (B,H,Lk,dh).  Masks built in-kernel (no HBM bias)."""
    B, H, Lq, dh = q.shape
    Lk = k.shape[2]
    tk = _pick_tile(Lk, tk, 128)
    n_kv = Lk // tk
    has_mask = attn_mask is not None
    has_kpm = key_padding_mask is not None

    in_specs = [
        pl.BlockSpec((1, H, Lq, dh), lambda b, s: (b, 0, 0, 0)),
        pl.BlockSpec((1, H, tk, dh), lambda b, s: (b, 0, s, 0)),
        pl.BlockSpec((1, H, tk, dh), lambda b, s: (b, 0, s, 0)),
    ]
    args = [q, k, v]
    if has_mask:
        # -inf -> -1e30 so a fully-masked row cannot produce NaN.
        mask = jnp.maximum(attn_mask.astype(jnp.float32), -1e30)
        in_specs.append(pl.BlockSpec((Lq, tk), lambda b, s: (0, s)))
        args.append(mask)
    if has_kpm:
        kpm = jnp.where(key_padding_mask, -1e30, 0.0).astype(jnp.float32)
        kpm = kpm.reshape(B, 1, Lk)
        in_specs.append(pl.BlockSpec((1, 1, tk), lambda b, s: (b, 0, s)))
        args.append(kpm)

    kernel = functools.partial(_attn_kernel, scale=scale,
                               has_mask=has_mask, has_kpm=has_kpm)
    return pl.pallas_call(
        kernel,
        out_shape=jax.ShapeDtypeStruct((B, H, Lq, dh), jnp.float32),
        grid=(B, n_kv),
        in_specs=in_specs,
        out_specs=pl.BlockSpec((1, H, Lq, dh), lambda b, s: (b, 0, 0, 0)),
        scratch_shapes=[pltpu.VMEM((H, Lq, 1), jnp.float32),
                        pltpu.VMEM((H, Lq, 1), jnp.float32),
                        pltpu.VMEM((H, Lq, dh), jnp.float32)],
        compiler_params=pltpu.CompilerParams(
            dimension_semantics=("parallel", "arbitrary")),
    )(*args)


# -------------------------- Transformer (glue) ----------------------------- #

def self_attention(x, p, n_head, attn_mask=None, key_padding_mask=None):
    """nn.MultiheadAttention self-attention (batch_first=False), fused QKV."""
    L, B, D = x.shape
    dh = D // n_head
    qkv = pallas_linear(x.reshape(L * B, D), p["qkv_w"], p["qkv_b"])    # (L*B, 3D)
    qkv = qkv.reshape(L, B, 3, n_head, dh)
    qkv = jnp.transpose(qkv, (2, 1, 3, 0, 4))                           # (3,B,H,L,dh)
    q, k, v = qkv[0], qkv[1], qkv[2]
    o = pallas_attention(q, k, v, attn_mask, key_padding_mask,
                         1.0 / math.sqrt(dh))                           # (B,H,L,dh)
    o = jnp.transpose(o, (2, 0, 1, 3)).reshape(L * B, D)
    return pallas_linear(o, p["out_w"], p["out_b"]).reshape(L, B, D)


def cross_attention(x, memory, p, n_head, key_padding_mask=None):
    """nn.MultiheadAttention cross-attention (query=x, key/value=memory)."""
    Lq, B, D = x.shape
    Lk = memory.shape[0]
    dh = D // n_head
    q = pallas_linear(x.reshape(Lq * B, D), p["q_w"], p["q_b"])         # (Lq*B, D)
    kv = pallas_linear(memory.reshape(Lk * B, D), p["kv_w"], p["kv_b"]) # (Lk*B, 2D)
    q = jnp.transpose(q.reshape(Lq, B, n_head, dh), (1, 2, 0, 3))       # (B,H,Lq,dh)
    kv = jnp.transpose(kv.reshape(Lk, B, 2, n_head, dh), (2, 1, 3, 0, 4))
    k, v = kv[0], kv[1]
    o = pallas_attention(q, k, v, None, key_padding_mask, 1.0 / math.sqrt(dh))
    o = jnp.transpose(o, (2, 0, 1, 3)).reshape(Lq * B, D)
    return pallas_linear(o, p["out_w"], p["out_b"]).reshape(Lq, B, D)


def encoder_layer(x, p, n_head, src_kpm):
    L, B, D = x.shape
    attn = self_attention(x, p["self_attn"], n_head, None, src_kpm)
    x = pallas_layernorm(attn.reshape(L * B, D), p["ln1_g"], p["ln1_b"],
                         residual=x.reshape(L * B, D)).reshape(L, B, D)
    h = pallas_linear(x.reshape(L * B, D), p["lin1_w"], p["lin1_b"], relu=True)
    h = pallas_linear(h, p["lin2_w"], p["lin2_b"])
    x = pallas_layernorm(h, p["ln2_g"], p["ln2_b"],
                         residual=x.reshape(L * B, D)).reshape(L, B, D)
    return x


def decoder_layer(x, memory, p, n_head, tgt_mask, tgt_kpm, mem_kpm):
    L, B, D = x.shape
    attn = self_attention(x, p["self_attn"], n_head, tgt_mask, tgt_kpm)
    x = pallas_layernorm(attn.reshape(L * B, D), p["ln1_g"], p["ln1_b"],
                         residual=x.reshape(L * B, D)).reshape(L, B, D)
    xatt = cross_attention(x, memory, p["cross_attn"], n_head, mem_kpm)
    x = pallas_layernorm(xatt.reshape(L * B, D), p["ln2_g"], p["ln2_b"],
                         residual=x.reshape(L * B, D)).reshape(L, B, D)
    h = pallas_linear(x.reshape(L * B, D), p["lin1_w"], p["lin1_b"], relu=True)
    h = pallas_linear(h, p["lin2_w"], p["lin2_b"])
    x = pallas_layernorm(h, p["ln3_g"], p["ln3_b"],
                         residual=x.reshape(L * B, D)).reshape(L, B, D)
    return x


def transformer_forward(params, src, tgt, tgt_mask, cfg,
                        src_pad_mask=None, tgt_pad_mask=None):
    D, H = cfg["d_model"], cfg["n_head"]
    emb = params["embedding"]
    pe = params["pos_encoding"]                          # (maxlen, 1, D)
    scale = math.sqrt(D)

    # Embedding gather stays in plain JAX (glue); scale matches the module.
    src_e = emb[src] * scale                             # (B, S, D)
    tgt_e = emb[tgt] * scale                             # (B, T, D)

    # PositionalEncoder: pos_encoding[:x.size(0)] added along axis 0 (faithful).
    # TODO(synk): dropout layers are identity (inference-mode semantics).
    src_e = src_e + pe[: src_e.shape[0]]
    tgt_e = tgt_e + pe[: tgt_e.shape[0]]

    src_e = jnp.transpose(src_e, (1, 0, 2))              # (S, B, D)
    tgt_e = jnp.transpose(tgt_e, (1, 0, 2))              # (T, B, D)

    # Encoder stack + final LayerNorm (nn.Transformer default).
    x = src_e
    for lp in params["encoder_layers"]:
        x = encoder_layer(x, lp, H, src_pad_mask)
    S, B, _ = x.shape
    memory = pallas_layernorm(x.reshape(S * B, D),
                              params["enc_norm_g"],
                              params["enc_norm_b"]).reshape(S, B, D)

    # Decoder stack + final LayerNorm.
    y = tgt_e
    for lp in params["decoder_layers"]:
        y = decoder_layer(y, memory, lp, H, tgt_mask, tgt_pad_mask, None)
    T = y.shape[0]
    y = pallas_layernorm(y.reshape(T * B, D),
                         params["dec_norm_g"],
                         params["dec_norm_b"]).reshape(T, B, D)

    # Output projection to vocabulary.
    out = pallas_linear(y.reshape(T * B, D), params["out_w"], params["out_b"])
    return out.reshape(T, B, -1)


# ----------------------------- Parameter init ------------------------------ #

def init_params(key, cfg):
    """All weight matrices are stored pre-transposed in (K, N) layout."""
    n_tokens, D, FF = cfg["n_tokens"], cfg["d_model"], cfg["ff"]
    maxlen = cfg["maxlen"]
    keys = iter(jax.random.split(key, 1024))

    def nrm(shape, s=0.02):
        return (s * jax.random.normal(next(keys), shape)).astype(jnp.float32)

    def self_attn_params():
        return {"qkv_w": nrm((D, 3 * D)), "qkv_b": jnp.zeros((3 * D,), jnp.float32),
                "out_w": nrm((D, D)), "out_b": jnp.zeros((D,), jnp.float32)}

    def cross_attn_params():
        return {"q_w": nrm((D, D)), "q_b": jnp.zeros((D,), jnp.float32),
                "kv_w": nrm((D, 2 * D)), "kv_b": jnp.zeros((2 * D,), jnp.float32),
                "out_w": nrm((D, D)), "out_b": jnp.zeros((D,), jnp.float32)}

    def enc_layer():
        return {"self_attn": self_attn_params(),
                "lin1_w": nrm((D, FF)), "lin1_b": jnp.zeros((FF,), jnp.float32),
                "lin2_w": nrm((FF, D)), "lin2_b": jnp.zeros((D,), jnp.float32),
                "ln1_g": jnp.ones((D,), jnp.float32), "ln1_b": jnp.zeros((D,), jnp.float32),
                "ln2_g": jnp.ones((D,), jnp.float32), "ln2_b": jnp.zeros((D,), jnp.float32)}

    def dec_layer():
        return {"self_attn": self_attn_params(), "cross_attn": cross_attn_params(),
                "lin1_w": nrm((D, FF)), "lin1_b": jnp.zeros((FF,), jnp.float32),
                "lin2_w": nrm((FF, D)), "lin2_b": jnp.zeros((D,), jnp.float32),
                "ln1_g": jnp.ones((D,), jnp.float32), "ln1_b": jnp.zeros((D,), jnp.float32),
                "ln2_g": jnp.ones((D,), jnp.float32), "ln2_b": jnp.zeros((D,), jnp.float32),
                "ln3_g": jnp.ones((D,), jnp.float32), "ln3_b": jnp.zeros((D,), jnp.float32)}

    # Positional encoding exactly as PositionalEncoder.__init__.
    pos = jnp.arange(maxlen, dtype=jnp.float32)[:, None]
    denom = jnp.exp(jnp.arange(0, D, 2, dtype=jnp.float32) * (-math.log(10000.0) / D))
    pe = jnp.zeros((maxlen, D), jnp.float32)
    pe = pe.at[:, 0::2].set(jnp.sin(pos * denom))
    pe = pe.at[:, 1::2].set(jnp.cos(pos * denom))
    pe = pe[:, None, :]                                    # (maxlen, 1, D)

    return {
        "embedding": nrm((n_tokens, D), 1.0),
        "pos_encoding": pe,
        "encoder_layers": [enc_layer() for _ in range(cfg["n_encoder"])],
        "decoder_layers": [dec_layer() for _ in range(cfg["n_decoder"])],
        "enc_norm_g": jnp.ones((D,), jnp.float32), "enc_norm_b": jnp.zeros((D,), jnp.float32),
        "dec_norm_g": jnp.ones((D,), jnp.float32), "dec_norm_b": jnp.zeros((D,), jnp.float32),
        "out_w": nrm((D, n_tokens)), "out_b": jnp.zeros((n_tokens,), jnp.float32),
    }


def get_tgt_mask(seq_length):
    tril = jnp.tril(jnp.ones((seq_length, seq_length), jnp.float32)) == 1
    return jnp.where(tril, 0.0, -jnp.inf).astype(jnp.float32)


# ---------------------------------- Main ----------------------------------- #

if __name__ == "__main__":
    cfg = dict(n_tokens=16, d_model=32, n_head=4, n_encoder=2, n_decoder=2,
               ff=64, maxlen=5000)
    key = jax.random.PRNGKey(0)
    pkey, skey, tkey = jax.random.split(key, 3)

    params = init_params(pkey, cfg)

    B, S, T = 2, 8, 8
    src = jax.random.randint(skey, (B, S), 0, cfg["n_tokens"], dtype=jnp.int32)
    tgt = jax.random.randint(tkey, (B, T), 0, cfg["n_tokens"], dtype=jnp.int32)
    tgt_mask = get_tgt_mask(T)

    fwd = jax.jit(functools.partial(transformer_forward, cfg=cfg))
    out = fwd(params, src, tgt, tgt_mask)
    out = jax.block_until_ready(out)

    assert out.shape == (T, B, cfg["n_tokens"]), out.shape
    assert bool(jnp.all(jnp.isfinite(out)))
    print("KERNEL_OK")
</pallas_src>

<mosaic_0001>
module attributes {stable_mosaic.version = 11 : i64} {
  func.func @_matmul_kernel(%arg0: i32, %arg1: i32, %arg2: i32, %arg3: memref<16x32xf32, #tpu.memory_space<vmem>>, %arg4: memref<32x96xf32, #tpu.memory_space<vmem>>, %arg5: memref<1x96xf32, #tpu.memory_space<vmem>>, %arg6: memref<16x96xf32, #tpu.memory_space<vmem>>, %arg7: memref<16x96xf32, #tpu.memory_space<vmem>>) attributes {dimension_semantics = [#tpu.dimension_semantics<parallel>, #tpu.dimension_semantics<parallel>, #tpu.dimension_semantics<arbitrary>], iteration_bounds = array<i64: 1, 1, 1>, scalar_prefetch = 0 : i64, scratch_operands = 1 : i64, tpu.core_type = #tpu.core_type<tc>, window_params = [{transform_indices = @transform_0, window_bounds = array<i64: 16, 32>}, {transform_indices = @transform_1, window_bounds = array<i64: 32, 96>}, {transform_indices = @transform_2, window_bounds = array<i64: 1, 96>}, {transform_indices = @transform_3, window_bounds = array<i64: 16, 96>}]} {
    %c0_i32 = arith.constant 0 : i32
    %0 = arith.cmpi eq, %arg2, %c0_i32 : i32
    %1 = arith.extui %0 : i1 to i32
    %c0_i32_0 = arith.constant 0 : i32
    %2 = arith.cmpi ne, %1, %c0_i32_0 : i32
    scf.if %2 {
      %cst_10 = arith.constant 0.000000e+00 : f32
      %12 = vector.broadcast %cst_10 : f32 to vector<16x96xf32>
      %c0_11 = arith.constant 0 : index
      %c0_12 = arith.constant 0 : index
      %13 = vector.load %arg7[%c0_11, %c0_12] : memref<16x96xf32, #tpu.memory_space<vmem>>, vector<16x96xf32>
      tpu.vector_store %arg7[%c0_11, %c0_12], %12 {strides = array<i32>} : memref<16x96xf32, #tpu.memory_space<vmem>>, vector<16x96xf32>,
    } else {
    }
    %c0 = arith.constant 0 : index
    %c0_1 = arith.constant 0 : index
    %3 = vector.load %arg7[%c0, %c0_1] : memref<16x96xf32, #tpu.memory_space<vmem>>, vector<16x96xf32>
    %c0_2 = arith.constant 0 : index
    %c0_3 = arith.constant 0 : index
    %4 = vector.load %arg3[%c0_2, %c0_3] : memref<16x32xf32, #tpu.memory_space<vmem>>, vector<16x32xf32>
    %c0_4 = arith.constant 0 : index
    %c0_5 = arith.constant 0 : index
    %5 = vector.load %arg4[%c0_4, %c0_5] : memref<32x96xf32, #tpu.memory_space<vmem>>, vector<32x96xf32>
    %cst = arith.constant dense<0.000000e+00> : vector<16x96xf32>
    %6 = tpu.matmul %4, %5, %cst {dimension_numbers = #tpu.dot_dimension_numbers<[1], [0], [0], [1], [0, 0, 1, 1], [], []>} : vector<16x32xf32>, vector<32x96xf32>, vector<16x96xf32> -> vector<16x96xf32>
    %7 = arith.addf %3, %6 : vector<16x96xf32>
    %c0_6 = arith.constant 0 : index
    %c0_7 = arith.constant 0 : index
    %8 = vector.load %arg7[%c0_6, %c0_7] : memref<16x96xf32, #tpu.memory_space<vmem>>, vector<16x96xf32>
    tpu.vector_store %arg7[%c0_6, %c0_7], %7 {strides = array<i32>} : memref<16x96xf32, #tpu.memory_space<vmem>>, vector<16x96xf32>,
    %c0_i32_8 = arith.constant 0 : i32
    %9 = arith.cmpi eq, %arg2, %c0_i32_8 : i32
    %10 = arith.extui %9 : i1 to i32
    %c0_i32_9 = arith.constant 0 : i32
    %11 = arith.cmpi ne, %10, %c0_i32_9 : i32
    scf.if %11 {
      %c0_10 = arith.constant 0 : index
      %c0_11 = arith.constant 0 : index
      %12 = vector.load %arg7[%c0_10, %c0_11] : memref<16x96xf32, #tpu.memory_space<vmem>>, vector<16x96xf32>
      %c0_12 = arith.constant 0 : index
      %c0_13 = arith.constant 0 : index
      %13 = vector.load %arg5[%c0_12, %c0_13] : memref<1x96xf32, #tpu.memory_space<vmem>>, vector<1x96xf32>
      %14 = vector.broadcast %13 : vector<1x96xf32> to vector<16x96xf32>
      %15 = arith.addf %12, %14 : vector<16x96xf32>
      %c0_14 = arith.constant 0 : index
      %c0_15 = arith.constant 0 : index
      %16 = vector.load %arg6[%c0_14, %c0_15] : memref<16x96xf32, #tpu.memory_space<vmem>>, vector<16x96xf32>
      tpu.vector_store %arg6[%c0_14, %c0_15], %15 {strides = array<i32>} : memref<16x96xf32, #tpu.memory_space<vmem>>, vector<16x96xf32>,
    } else {
    }
    return
  }
  func.func @transform_0(%arg0: i32, %arg1: i32, %arg2: i32) -> (i32, i32) {
    %c0_i32 = arith.constant 0 : i32
    return %arg0, %arg2 : i32, i32
  }
  func.func @transform_1(%arg0: i32, %arg1: i32, %arg2: i32) -> (i32, i32) {
    %c0_i32 = arith.constant 0 : i32
    return %arg2, %arg1 : i32, i32
  }
  func.func @transform_2(%arg0: i32, %arg1: i32, %arg2: i32) -> (i32, i32) {
    %c0_i32 = arith.constant 0 : i32
    %c0_i32_0 = arith.constant 0 : i32
    return %c0_i32, %arg1 : i32, i32
  }
  func.func @transform_3(%arg0: i32, %arg1: i32, %arg2: i32) -> (i32, i32) {
    %c0_i32 = arith.constant 0 : i32
    return %arg0, %arg1 : i32, i32
  }
}

module attributes {stable_mosaic.version = 11 : i64} {
  func.func @_attn_kernel(%arg0: i32, %arg1: i32, %arg2: memref<1x4x8x8xf32, #tpu.memory_space<vmem>>, %arg3: memref<1x4x8x8xf32, #tpu.memory_space<vmem>>, %arg4: memref<1x4x8x8xf32, #tpu.memory_space<vmem>>, %arg5: memref<8x8xf32, #tpu.memory_space<vmem>>, %arg6: memref<1x4x8x8xf32, #tpu.memory_space<vmem>>, %arg7: memref<4x8x1xf32, #tpu.memory_space<vmem>>, %arg8: memref<4x8x1xf32, #tpu.memory_space<vmem>>, %arg9: memref<4x8x8xf32, #tpu.memory_space<vmem>>) attributes {dimension_semantics = [#tpu.dimension_semantics<parallel>, #tpu.dimension_semantics<arbitrary>], iteration_bounds = array<i64: 2, 1>, scalar_prefetch = 0 : i64, scratch_operands = 3 : i64, tpu.core_type = #tpu.core_type<tc>, window_params = [{transform_indices = @transform_0, window_bounds = array<i64: 1, 4, 8, 8>}, {transform_indices = @transform_1, window_bounds = array<i64: 1, 4, 8, 8>}, {transform_indices = @transform_2, window_bounds = array<i64: 1, 4, 8, 8>}, {transform_indices = @transform_3, window_bounds = array<i64: 8, 8>}, {transform_indices = @transform_4, window_bounds = array<i64: 1, 4, 8, 8>}]} {
    %c0_i32 = arith.constant 0 : i32
    %0 = arith.cmpi eq, %arg1, %c0_i32 : i32
    %1 = arith.extui %0 : i1 to i32
    %c0_i32_0 = arith.constant 0 : i32
    %2 = arith.cmpi ne, %1, %c0_i32_0 : i32
    scf.if %2 {
      %cst_38 = arith.constant 0xFF800000 : f32
      %41 = vector.broadcast %cst_38 : f32 to vector<4x8x1xf32>
      %c0_39 = arith.constant 0 : index
      %c0_40 = arith.constant 0 : index
      %c0_41 = arith.constant 0 : index
      %42 = vector.load %arg7[%c0_39, %c0_40, %c0_41] : memref<4x8x1xf32, #tpu.memory_space<vmem>>, vector<4x8x1xf32>
      tpu.vector_store %arg7[%c0_39, %c0_40, %c0_41], %41 {strides = array<i32>} : memref<4x8x1xf32, #tpu.memory_space<vmem>>, vector<4x8x1xf32>,
      %cst_42 = arith.constant 0.000000e+00 : f32
      %43 = vector.broadcast %cst_42 : f32 to vector<4x8x1xf32>
      %c0_43 = arith.constant 0 : index
      %c0_44 = arith.constant 0 : index
      %c0_45 = arith.constant 0 : index
      %44 = vector.load %arg8[%c0_43, %c0_44, %c0_45] : memref<4x8x1xf32, #tpu.memory_space<vmem>>, vector<4x8x1xf32>
      tpu.vector_store %arg8[%c0_43, %c0_44, %c0_45], %43 {strides = array<i32>} : memref<4x8x1xf32, #tpu.memory_space<vmem>>, vector<4x8x1xf32>,
      %cst_46 = arith.constant 0.000000e+00 : f32
      %45 = vector.broadcast %cst_46 : f32 to vector<4x8x8xf32>
      %c0_47 = arith.constant 0 : index
      %c0_48 = arith.constant 0 : index
      %c0_49 = arith.constant 0 : index
      %46 = vector.load %arg9[%c0_47, %c0_48, %c0_49] : memref<4x8x8xf32, #tpu.memory_space<vmem>>, vector<4x8x8xf32>
      tpu.vector_store %arg9[%c0_47, %c0_48, %c0_49], %45 {strides = array<i32>} : memref<4x8x8xf32, #tpu.memory_space<vmem>>, vector<4x8x8xf32>,
    } else {
    }
    %c0 = arith.constant 0 : index
    %c0_1 = arith.constant 0 : index
    %c0_2 = arith.constant 0 : index
    %c0_3 = arith.constant 0 : index
    %3 = vector.load %arg2[%c0, %c0_1, %c0_2, %c0_3] : memref<1x4x8x8xf32, #tpu.memory_space<vmem>>, vector<1x4x8x8xf32>
    %4 = vector.shape_cast %3 : vector<1x4x8x8xf32> to vector<4x8x8xf32>
    %c0_4 = arith.constant 0 : index
    %c0_5 = arith.constant 0 : index
    %c0_6 = arith.constant 0 : index
    %c0_7 = arith.constant 0 : index
    %5 = vector.load %arg3[%c0_4, %c0_5, %c0_6, %c0_7] : memref<1x4x8x8xf32, #tpu.memory_space<vmem>>, vector<1x4x8x8xf32>
    %6 = vector.shape_cast %5 : vector<1x4x8x8xf32> to vector<4x8x8xf32>
    %c0_8 = arith.constant 0 : index
    %c0_9 = arith.constant 0 : index
    %c0_10 = arith.constant 0 : index
    %c0_11 = arith.constant 0 : index
    %7 = vector.load %arg4[%c0_8, %c0_9, %c0_10, %c0_11] : memref<1x4x8x8xf32, #tpu.memory_space<vmem>>, vector<1x4x8x8xf32>
    %8 = vector.shape_cast %7 : vector<1x4x8x8xf32> to vector<4x8x8xf32>
    "tpu.trace_start"() <{level = 10 : i32, message = "hqd,hkd->hqk"}> : () -> ()
    %cst = arith.constant dense<0.000000e+00> : vector<4x8x8xf32>
    %9 = tpu.matmul %4, %6, %cst {dimension_numbers = #tpu.dot_dimension_numbers<[2], [2], [1], [1], [0, 0, 0, 1, 1, 1], [0], [0]>} : vector<4x8x8xf32>, vector<4x8x8xf32>, vector<4x8x8xf32> -> vector<4x8x8xf32>
    "tpu.trace_stop"() : () -> ()
    %cst_12 = arith.constant 0.353553385 : f32
    %10 = vector.broadcast %cst_12 : f32 to vector<4x8x8xf32>
    %11 = arith.mulf %9, %10 : vector<4x8x8xf32>
    %c0_13 = arith.constant 0 : index
    %c0_14 = arith.constant 0 : index
    %12 = vector.load %arg5[%c0_13, %c0_14] : memref<8x8xf32, #tpu.memory_space<vmem>>, vector<8x8xf32>
    %13 = vector.shape_cast %12 : vector<8x8xf32> to vector<1x8x8xf32>
    %14 = vector.broadcast %13 : vector<1x8x8xf32> to vector<4x8x8xf32>
    %15 = arith.addf %11, %14 : vector<4x8x8xf32>
    %c0_15 = arith.constant 0 : index
    %c0_16 = arith.constant 0 : index
    %c0_17 = arith.constant 0 : index
    %16 = vector.load %arg7[%c0_15, %c0_16, %c0_17] : memref<4x8x1xf32, #tpu.memory_space<vmem>>, vector<4x8x1xf32>
    %cst_18 = arith.constant dense<0xFF800000> : vector<4x8xf32>
    %17 = vector.multi_reduction <maximumf>, %15, %cst_18 [2] : vector<4x8x8xf32> to vector<4x8xf32>
    %18 = vector.shape_cast %17 : vector<4x8xf32> to vector<4x8x1xf32>
    %19 = arith.maximumf %16, %18 : vector<4x8x1xf32>
    %20 = arith.subf %16, %19 : vector<4x8x1xf32>
    %21 = math.exp %20 : vector<4x8x1xf32>
    %22 = vector.broadcast %19 : vector<4x8x1xf32> to vector<4x8x8xf32>
    %23 = arith.subf %15, %22 : vector<4x8x8xf32>
    %24 = math.exp %23 : vector<4x8x8xf32>
    %c0_19 = arith.constant 0 : index
    %c0_20 = arith.constant 0 : index
    %c0_21 = arith.constant 0 : index
    %25 = vector.load %arg8[%c0_19, %c0_20, %c0_21] : memref<4x8x1xf32, #tpu.memory_space<vmem>>, vector<4x8x1xf32>
    %26 = arith.mulf %21, %25 : vector<4x8x1xf32>
    %cst_22 = arith.constant dense<0.000000e+00> : vector<4x8xf32>
    %27 = vector.multi_reduction <add>, %24, %cst_22 [2] : vector<4x8x8xf32> to vector<4x8xf32>
    %28 = vector.shape_cast %27 : vector<4x8xf32> to vector<4x8x1xf32>
    %29 = arith.addf %26, %28 : vector<4x8x1xf32>
    %c0_23 = arith.constant 0 : index
    %c0_24 = arith.constant 0 : index
    %c0_25 = arith.constant 0 : index
    %30 = vector.load %arg8[%c0_23, %c0_24, %c0_25] : memref<4x8x1xf32, #tpu.memory_space<vmem>>, vector<4x8x1xf32>
    tpu.vector_store %arg8[%c0_23, %c0_24, %c0_25], %29 {strides = array<i32>} : memref<4x8x1xf32, #tpu.memory_space<vmem>>, vector<4x8x1xf32>,
    %c0_26 = arith.constant 0 : index
    %c0_27 = arith.constant 0 : index
    %c0_28 = arith.constant 0 : index
    %31 = vector.load %arg9[%c0_26, %c0_27, %c0_28] : memref<4x8x8xf32, #tpu.memory_space<vmem>>, vector<4x8x8xf32>
    %32 = vector.broadcast %21 : vector<4x8x1xf32> to vector<4x8x8xf32>
    %33 = arith.mulf %32, %31 : vector<4x8x8xf32>
    "tpu.trace_start"() <{level = 10 : i32, message = "hqk,hkd->hqd"}> : () -> ()
    %cst_29 = arith.constant dense<0.000000e+00> : vector<4x8x8xf32>
    %34 = tpu.matmul %24, %8, %cst_29 {dimension_numbers = #tpu.dot_dimension_numbers<[2], [1], [1], [2], [0, 0, 0, 1, 1, 2], [0], [0]>} : vector<4x8x8xf32>, vector<4x8x8xf32>, vector<4x8x8xf32> -> vector<4x8x8xf32>
    "tpu.trace_stop"() : () -> ()
    %35 = arith.addf %33, %34 : vector<4x8x8xf32>
    %c0_30 = arith.constant 0 : index
    %c0_31 = arith.constant 0 : index
    %c0_32 = arith.constant 0 : index
    %36 = vector.load %arg9[%c0_30, %c0_31, %c0_32] : memref<4x8x8xf32, #tpu.memory_space<vmem>>, vector<4x8x8xf32>
    tpu.vector_store %arg9[%c0_30, %c0_31, %c0_32], %35 {strides = array<i32>} : memref<4x8x8xf32, #tpu.memory_space<vmem>>, vector<4x8x8xf32>,
    %c0_33 = arith.constant 0 : index
    %c0_34 = arith.constant 0 : index
    %c0_35 = arith.constant 0 : index
    %37 = vector.load %arg7[%c0_33, %c0_34, %c0_35] : memref<4x8x1xf32, #tpu.memory_space<vmem>>, vector<4x8x1xf32>
    tpu.vector_store %arg7[%c0_33, %c0_34, %c0_35], %19 {strides = array<i32>} : memref<4x8x1xf32, #tpu.memory_space<vmem>>, vector<4x8x1xf32>,
    %c0_i32_36 = arith.constant 0 : i32
    %38 = arith.cmpi eq, %arg1, %c0_i32_36 : i32
    %39 = arith.extui %38 : i1 to i32
    %c0_i32_37 = arith.constant 0 : i32
    %40 = arith.cmpi ne, %39, %c0_i32_37 : i32
    scf.if %40 {
      %c0_38 = arith.constant 0 : index
      %c0_39 = arith.constant 0 : index
      %c0_40 = arith.constant 0 : index
      %41 = vector.load %arg9[%c0_38, %c0_39, %c0_40] : memref<4x8x8xf32, #tpu.memory_space<vmem>>, vector<4x8x8xf32>
      %c0_41 = arith.constant 0 : index
      %c0_42 = arith.constant 0 : index
      %c0_43 = arith.constant 0 : index
      %42 = vector.load %arg8[%c0_41, %c0_42, %c0_43] : memref<4x8x1xf32, #tpu.memory_space<vmem>>, vector<4x8x1xf32>
      %43 = tpu.reciprocal %42 {approx = true} : vector<4x8x1xf32> -> vector<4x8x1xf32>
      %44 = vector.broadcast %43 : vector<4x8x1xf32> to vector<4x8x8xf32>
      %45 = arith.mulf %41, %44 : vector<4x8x8xf32>
      %c0_44 = arith.constant 0 : index
      %c0_45 = arith.constant 0 : index
      %c0_46 = arith.constant 0 : index
      %c0_47 = arith.constant 0 : index
      %46 = vector.load %arg6[%c0_44, %c0_45, %c0_46, %c0_47] : memref<1x4x8x8xf32, #tpu.memory_space<vmem>>, vector<1x4x8x8xf32>
      %47 = vector.shape_cast %46 : vector<1x4x8x8xf32> to vector<4x8x8xf32>
      %48 = vector.shape_cast %45 : vector<4x8x8xf32> to vector<1x4x8x8xf32>
      tpu.vector_store %arg6[%c0_44, %c0_45, %c0_46, %c0_47], %48 {strides = array<i32>} : memref<1x4x8x8xf32, #tpu.memory_space<vmem>>, vector<1x4x8x8xf32>,
    } else {
    }
    return
  }
  func.func @transform_0(%arg0: i32, %arg1: i32) -> (i32, i32, i32, i32) {
    %c0_i32 = arith.constant 0 : i32
    %c0_i32_0 = arith.constant 0 : i32
    %c0_i32_1 = arith.constant 0 : i32
    %c0_i32_2 = arith.constant 0 : i32
    return %arg0, %c0_i32, %c0_i32_0, %c0_i32_1 : i32, i32, i32, i32
  }
  func.func @transform_1(%arg0: i32, %arg1: i32) -> (i32, i32, i32, i32) {
    %c0_i32 = arith.constant 0 : i32
    %c0_i32_0 = arith.constant 0 : i32
    %c0_i32_1 = arith.constant 0 : i32
    return %arg0, %c0_i32, %arg1, %c0_i32_0 : i32, i32, i32, i32
  }
  func.func @transform_2(%arg0: i32, %arg1: i32) -> (i32, i32, i32, i32) {
    %c0_i32 = arith.constant 0 : i32
    %c0_i32_0 = arith.constant 0 : i32
    %c0_i32_1 = arith.constant 0 : i32
    return %arg0, %c0_i32, %arg1, %c0_i32_0 : i32, i32, i32, i32
  }
  func.func @transform_3(%arg0: i32, %arg1: i32) -> (i32, i32) {
    %c0_i32 = arith.constant 0 : i32
    %c0_i32_0 = arith.constant 0 : i32
    return %c0_i32, %arg1 : i32, i32
  }
  func.func @transform_4(%arg0: i32, %arg1: i32) -> (i32, i32, i32, i32) {
    %c0_i32 = arith.constant 0 : i32
    %c0_i32_0 = arith.constant 0 : i32
    %c0_i32_1 = arith.constant 0 : i32
    %c0_i32_2 = arith.constant 0 : i32
    return %arg0, %c0_i32, %c0_i32_0, %c0_i32_1 : i32, i32, i32, i32
  }
}

module attributes {stable_mosaic.version = 11 : i64} {
  func.func @_matmul_kernel(%arg0: i32, %arg1: i32, %arg2: i32, %arg3: memref<16x32xf32, #tpu.memory_space<vmem>>, %arg4: memref<32x32xf32, #tpu.memory_space<vmem>>, %arg5: memref<1x32xf32, #tpu.memory_space<vmem>>, %arg6: memref<16x32xf32, #tpu.memory_space<vmem>>, %arg7: memref<16x32xf32, #tpu.memory_space<vmem>>) attributes {dimension_semantics = [#tpu.dimension_semantics<parallel>, #tpu.dimension_semantics<parallel>, #tpu.dimension_semantics<arbitrary>], iteration_bounds = array<i64: 1, 1, 1>, scalar_prefetch = 0 : i64, scratch_operands = 1 : i64, tpu.core_type = #tpu.core_type<tc>, window_params = [{transform_indices = @transform_0, window_bounds = array<i64: 16, 32>}, {transform_indices = @transform_1, window_bounds = array<i64: 32, 32>}, {transform_indices = @transform_2, window_bounds = array<i64: 1, 32>}, {transform_indices = @transform_3, window_bounds = array<i64: 16, 32>}]} {
    %c0_i32 = arith.constant 0 : i32
    %0 = arith.cmpi eq, %arg2, %c0_i32 : i32
    %1 = arith.extui %0 : i1 to i32
    %c0_i32_0 = arith.constant 0 : i32
    %2 = arith.cmpi ne, %1, %c0_i32_0 : i32
    scf.if %2 {
      %cst_10 = arith.constant 0.000000e+00 : f32
      %12 = vector.broadcast %cst_10 : f32 to vector<16x32xf32>
      %c0_11 = arith.constant 0 : index
      %c0_12 = arith.constant 0 : index
      %13 = vector.load %arg7[%c0_11, %c0_12] : memref<16x32xf32, #tpu.memory_space<vmem>>, vector<16x32xf32>
      tpu.vector_store %arg7[%c0_11, %c0_12], %12 {strides = array<i32>} : memref<16x32xf32, #tpu.memory_space<vmem>>, vector<16x32xf32>,
    } else {
    }
    %c0 = arith.constant 0 : index
    %c0_1 = arith.constant 0 : index
    %3 = vector.load %arg7[%c0, %c0_1] : memref<16x32xf32, #tpu.memory_space<vmem>>, vector<16x32xf32>
    %c0_2 = arith.constant 0 : index
    %c0_3 = arith.constant 0 : index
    %4 = vector.load %arg3[%c0_2, %c0_3] : memref<16x32xf32, #tpu.memory_space<vmem>>, vector<16x32xf32>
    %c0_4 = arith.constant 0 : index
    %c0_5 = arith.constant 0 : index
    %5 = vector.load %arg4[%c0_4, %c0_5] : memref<32x32xf32, #tpu.memory_space<vmem>>, vector<32x32xf32>
    %cst = arith.constant dense<0.000000e+00> : vector<16x32xf32>
    %6 = tpu.matmul %4, %5, %cst {dimension_numbers = #tpu.dot_dimension_numbers<[1], [0], [0], [1], [0, 0, 1, 1], [], []>} : vector<16x32xf32>, vector<32x32xf32>, vector<16x32xf32> -> vector<16x32xf32>
    %7 = arith.addf %3, %6 : vector<16x32xf32>
    %c0_6 = arith.constant 0 : index
    %c0_7 = arith.constant 0 : index
    %8 = vector.load %arg7[%c0_6, %c0_7] : memref<16x32xf32, #tpu.memory_space<vmem>>, vector<16x32xf32>
    tpu.vector_store %arg7[%c0_6, %c0_7], %7 {strides = array<i32>} : memref<16x32xf32, #tpu.memory_space<vmem>>, vector<16x32xf32>,
    %c0_i32_8 = arith.constant 0 : i32
    %9 = arith.cmpi eq, %arg2, %c0_i32_8 : i32
    %10 = arith.extui %9 : i1 to i32
    %c0_i32_9 = arith.constant 0 : i32
    %11 = arith.cmpi ne, %10, %c0_i32_9 : i32
    scf.if %11 {
      %c0_10 = arith.constant 0 : index
      %c0_11 = arith.constant 0 : index
      %12 = vector.load %arg7[%c0_10, %c0_11] : memref<16x32xf32, #tpu.memory_space<vmem>>, vector<16x32xf32>
      %c0_12 = arith.constant 0 : index
      %c0_13 = arith.constant 0 : index
      %13 = vector.load %arg5[%c0_12, %c0_13] : memref<1x32xf32, #tpu.memory_space<vmem>>, vector<1x32xf32>
      %14 = vector.broadcast %13 : vector<1x32xf32> to vector<16x32xf32>
      %15 = arith.addf %12, %14 : vector<16x32xf32>
      %c0_14 = arith.constant 0 : index
      %c0_15 = arith.constant 0 : index
      %16 = vector.load %arg6[%c0_14, %c0_15] : memref<16x32xf32, #tpu.memory_space<vmem>>, vector<16x32xf32>
      tpu.vector_store %arg6[%c0_14, %c0_15], %15 {strides = array<i32>} : memref<16x32xf32, #tpu.memory_space<vmem>>, vector<16x32xf32>,
    } else {
    }
    return
  }
  func.func @transform_0(%arg0: i32, %arg1: i32, %arg2: i32) -> (i32, i32) {
    %c0_i32 = arith.constant 0 : i32
    return %arg0, %arg2 : i32, i32
  }
  func.func @transform_1(%arg0: i32, %arg1: i32, %arg2: i32) -> (i32, i32) {
    %c0_i32 = arith.constant 0 : i32
    return %arg2, %arg1 : i32, i32
  }
  func.func @transform_2(%arg0: i32, %arg1: i32, %arg2: i32) -> (i32, i32) {
    %c0_i32 = arith.constant 0 : i32
    %c0_i32_0 = arith.constant 0 : i32
    return %c0_i32, %arg1 : i32, i32
  }
  func.func @transform_3(%arg0: i32, %arg1: i32, %arg2: i32) -> (i32, i32) {
    %c0_i32 = arith.constant 0 : i32
    return %arg0, %arg1 : i32, i32
  }
}

module attributes {stable_mosaic.version = 11 : i64} {
  func.func @_layernorm_kernel(%arg0: i32, %arg1: memref<16x32xf32, #tpu.memory_space<vmem>>, %arg2: memref<16x32xf32, #tpu.memory_space<vmem>>, %arg3: memref<1x32xf32, #tpu.memory_space<vmem>>, %arg4: memref<1x32xf32, #tpu.memory_space<vmem>>, %arg5: memref<16x32xf32, #tpu.memory_space<vmem>>) attributes {dimension_semantics = [#tpu.dimension_semantics<parallel>], iteration_bounds = array<i64: 1>, scalar_prefetch = 0 : i64, scratch_operands = 0 : i64, tpu.core_type = #tpu.core_type<tc>, window_params = [{transform_indices = @transform_0, window_bounds = array<i64: 16, 32>}, {transform_indices = @transform_1, window_bounds = array<i64: 16, 32>}, {pipeline_mode = #tpu.pipeline_mode<synchronous>, transform_indices = @transform_2, window_bounds = array<i64: 1, 32>}, {pipeline_mode = #tpu.pipeline_mode<synchronous>, transform_indices = @transform_3, window_bounds = array<i64: 1, 32>}, {transform_indices = @transform_4, window_bounds = array<i64: 16, 32>}]} {
    %c0 = arith.constant 0 : index
    %c0_0 = arith.constant 0 : index
    %0 = vector.load %arg1[%c0, %c0_0] : memref<16x32xf32, #tpu.memory_space<vmem>>, vector<16x32xf32>
    %c0_1 = arith.constant 0 : index
    %c0_2 = arith.constant 0 : index
    %1 = vector.load %arg2[%c0_1, %c0_2] : memref<16x32xf32, #tpu.memory_space<vmem>>, vector<16x32xf32>
    %2 = arith.addf %0, %1 : vector<16x32xf32>
    %cst = arith.constant dense<0.000000e+00> : vector<16xf32>
    %3 = vector.multi_reduction <add>, %2, %cst [1] : vector<16x32xf32> to vector<16xf32>
    %4 = vector.shape_cast %3 : vector<16xf32> to vector<16x1xf32>
    %cst_3 = arith.constant 3.200000e+01 : f32
    %5 = vector.broadcast %cst_3 : f32 to vector<16x1xf32>
    %6 = arith.divf %4, %5 : vector<16x1xf32>
    %7 = vector.broadcast %6 : vector<16x1xf32> to vector<16x32xf32>
    %8 = arith.subf %2, %7 : vector<16x32xf32>
    %9 = arith.mulf %8, %8 : vector<16x32xf32>
    %cst_4 = arith.constant dense<0.000000e+00> : vector<16xf32>
    %10 = vector.multi_reduction <add>, %9, %cst_4 [1] : vector<16x32xf32> to vector<16xf32>
    %11 = vector.shape_cast %10 : vector<16xf32> to vector<16x1xf32>
    %cst_5 = arith.constant 3.200000e+01 : f32
    %12 = vector.broadcast %cst_5 : f32 to vector<16x1xf32>
    %13 = arith.divf %11, %12 : vector<16x1xf32>
    %14 = vector.broadcast %6 : vector<16x1xf32> to vector<16x32xf32>
    %15 = arith.subf %2, %14 : vector<16x32xf32>
    %cst_6 = arith.constant 9.99999974E-6 : f32
    %16 = vector.broadcast %cst_6 : f32 to vector<16x1xf32>
    %17 = arith.addf %13, %16 : vector<16x1xf32>
    %18 = math.rsqrt %17 : vector<16x1xf32>
    %19 = vector.broadcast %18 : vector<16x1xf32> to vector<16x32xf32>
    %20 = arith.mulf %15, %19 : vector<16x32xf32>
    %c0_7 = arith.constant 0 : index
    %c0_8 = arith.constant 0 : index
    %21 = vector.load %arg3[%c0_7, %c0_8] : memref<1x32xf32, #tpu.memory_space<vmem>>, vector<1x32xf32>
    %22 = vector.broadcast %21 : vector<1x32xf32> to vector<16x32xf32>
    %23 = arith.mulf %20, %22 : vector<16x32xf32>
    %c0_9 = arith.constant 0 : index
    %c0_10 = arith.constant 0 : index
    %24 = vector.load %arg4[%c0_9, %c0_10] : memref<1x32xf32, #tpu.memory_space<vmem>>, vector<1x32xf32>
    %25 = vector.broadcast %24 : vector<1x32xf32> to vector<16x32xf32>
    %26 = arith.addf %23, %25 : vector<16x32xf32>
    %c0_11 = arith.constant 0 : index
    %c0_12 = arith.constant 0 : index
    %27 = vector.load %arg5[%c0_11, %c0_12] : memref<16x32xf32, #tpu.memory_space<vmem>>, vector<16x32xf32>
    tpu.vector_store %arg5[%c0_11, %c0_12], %26 {strides = array<i32>} : memref<16x32xf32, #tpu.memory_space<vmem>>, vector<16x32xf32>,
    return
  }
  func.func @transform_0(%arg0: i32) -> (i32, i32) {
    %c0_i32 = arith.constant 0 : i32
    %c0_i32_0 = arith.constant 0 : i32
    return %arg0, %c0_i32 : i32, i32
  }
  func.func @transform_1(%arg0: i32) -> (i32, i32) {
    %c0_i32 = arith.constant 0 : i32
    %c0_i32_0 = arith.constant 0 : i32
    return %arg0, %c0_i32 : i32, i32
  }
  func.func @transform_2(%arg0: i32) -> (i32, i32) {
    %c0_i32 = arith.constant 0 : i32
    %c0_i32_0 = arith.constant 0 : i32
    %c0_i32_1 = arith.constant 0 : i32
    return %c0_i32, %c0_i32_0 : i32, i32
  }
  func.func @transform_3(%arg0: i32) -> (i32, i32) {
    %c0_i32 = arith.constant 0 : i32
    %c0_i32_0 = arith.constant 0 : i32
    %c0_i32_1 = arith.constant 0 : i32
    return %c0_i32, %c0_i32_0 : i32, i32
  }
  func.func @transform_4(%arg0: i32) -> (i32, i32) {
    %c0_i32 = arith.constant 0 : i32
    %c0_i32_0 = arith.constant 0 : i32
    return %arg0, %c0_i32 : i32, i32
  }
}

module attributes {stable_mosaic.version = 11 : i64} {
  func.func @_attn_kernel(%arg0: i32, %arg1: i32, %arg2: memref<1x4x8x8xf32, #tpu.memory_space<vmem>>, %arg3: memref<1x4x8x8xf32, #tpu.memory_space<vmem>>, %arg4: memref<1x4x8x8xf32, #tpu.memory_space<vmem>>, %arg5: memref<1x4x8x8xf32, #tpu.memory_space<vmem>>, %arg6: memref<4x8x1xf32, #tpu.memory_space<vmem>>, %arg7: memref<4x8x1xf32, #tpu.memory_space<vmem>>, %arg8: memref<4x8x8xf32, #tpu.memory_space<vmem>>) attributes {dimension_semantics = [#tpu.dimension_semantics<parallel>, #tpu.dimension_semantics<arbitrary>], iteration_bounds = array<i64: 2, 1>, scalar_prefetch = 0 : i64, scratch_operands = 3 : i64, tpu.core_type = #tpu.core_type<tc>, window_params = [{transform_indices = @transform_0, window_bounds = array<i64: 1, 4, 8, 8>}, {transform_indices = @transform_1, window_bounds = array<i64: 1, 4, 8, 8>}, {transform_indices = @transform_2, window_bounds = array<i64: 1, 4, 8, 8>}, {transform_indices = @transform_3, window_bounds = array<i64: 1, 4, 8, 8>}]} {
    %c0_i32 = arith.constant 0 : i32
    %0 = arith.cmpi eq, %arg1, %c0_i32 : i32
    %1 = arith.extui %0 : i1 to i32
    %c0_i32_0 = arith.constant 0 : i32
    %2 = arith.cmpi ne, %1, %c0_i32_0 : i32
    scf.if %2 {
      %cst_36 = arith.constant 0xFF800000 : f32
      %37 = vector.broadcast %cst_36 : f32 to vector<4x8x1xf32>
      %c0_37 = arith.constant 0 : index
      %c0_38 = arith.constant 0 : index
      %c0_39 = arith.constant 0 : index
      %38 = vector.load %arg6[%c0_37, %c0_38, %c0_39] : memref<4x8x1xf32, #tpu.memory_space<vmem>>, vector<4x8x1xf32>
      tpu.vector_store %arg6[%c0_37, %c0_38, %c0_39], %37 {strides = array<i32>} : memref<4x8x1xf32, #tpu.memory_space<vmem>>, vector<4x8x1xf32>,
      %cst_40 = arith.constant 0.000000e+00 : f32
      %39 = vector.broadcast %cst_40 : f32 to vector<4x8x1xf32>
      %c0_41 = arith.constant 0 : index
      %c0_42 = arith.constant 0 : index
      %c0_43 = arith.constant 0 : index
      %40 = vector.load %arg7[%c0_41, %c0_42, %c0_43] : memref<4x8x1xf32, #tpu.memory_space<vmem>>, vector<4x8x1xf32>
      tpu.vector_store %arg7[%c0_41, %c0_42, %c0_43], %39 {strides = array<i32>} : memref<4x8x1xf32, #tpu.memory_space<vmem>>, vector<4x8x1xf32>,
      %cst_44 = arith.constant 0.000000e+00 : f32
      %41 = vector.broadcast %cst_44 : f32 to vector<4x8x8xf32>
      %c0_45 = arith.constant 0 : index
      %c0_46 = arith.constant 0 : index
      %c0_47 = arith.constant 0 : index
      %42 = vector.load %arg8[%c0_45, %c0_46, %c0_47] : memref<4x8x8xf32, #tpu.memory_space<vmem>>, vector<4x8x8xf32>
      tpu.vector_store %arg8[%c0_45, %c0_46, %c0_47], %41 {strides = array<i32>} : memref<4x8x8xf32, #tpu.memory_space<vmem>>, vector<4x8x8xf32>,
    } else {
    }
    %c0 = arith.constant 0 : index
    %c0_1 = arith.constant 0 : index
    %c0_2 = arith.constant 0 : index
    %c0_3 = arith.constant 0 : index
    %3 = vector.load %arg2[%c0, %c0_1, %c0_2, %c0_3] : memref<1x4x8x8xf32, #tpu.memory_space<vmem>>, vector<1x4x8x8xf32>
    %4 = vector.shape_cast %3 : vector<1x4x8x8xf32> to vector<4x8x8xf32>
    %c0_4 = arith.constant 0 : index
    %c0_5 = arith.constant 0 : index
    %c0_6 = arith.constant 0 : index
    %c0_7 = arith.constant 0 : index
    %5 = vector.load %arg3[%c0_4, %c0_5, %c0_6, %c0_7] : memref<1x4x8x8xf32, #tpu.memory_space<vmem>>, vector<1x4x8x8xf32>
    %6 = vector.shape_cast %5 : vector<1x4x8x8xf32> to vector<4x8x8xf32>
    %c0_8 = arith.constant 0 : index
    %c0_9 = arith.constant 0 : index
    %c0_10 = arith.constant 0 : index
    %c0_11 = arith.constant 0 : index
    %7 = vector.load %arg4[%c0_8, %c0_9, %c0_10, %c0_11] : memref<1x4x8x8xf32, #tpu.memory_space<vmem>>, vector<1x4x8x8xf32>
    %8 = vector.shape_cast %7 : vector<1x4x8x8xf32> to vector<4x8x8xf32>
    "tpu.trace_start"() <{level = 10 : i32, message = "hqd,hkd->hqk"}> : () -> ()
    %cst = arith.constant dense<0.000000e+00> : vector<4x8x8xf32>
    %9 = tpu.matmul %4, %6, %cst {dimension_numbers = #tpu.dot_dimension_numbers<[2], [2], [1], [1], [0, 0, 0, 1, 1, 1], [0], [0]>} : vector<4x8x8xf32>, vector<4x8x8xf32>, vector<4x8x8xf32> -> vector<4x8x8xf32>
    "tpu.trace_stop"() : () -> ()
    %cst_12 = arith.constant 0.353553385 : f32
    %10 = vector.broadcast %cst_12 : f32 to vector<4x8x8xf32>
    %11 = arith.mulf %9, %10 : vector<4x8x8xf32>
    %c0_13 = arith.constant 0 : index
    %c0_14 = arith.constant 0 : index
    %c0_15 = arith.constant 0 : index
    %12 = vector.load %arg6[%c0_13, %c0_14, %c0_15] : memref<4x8x1xf32, #tpu.memory_space<vmem>>, vector<4x8x1xf32>
    %cst_16 = arith.constant dense<0xFF800000> : vector<4x8xf32>
    %13 = vector.multi_reduction <maximumf>, %11, %cst_16 [2] : vector<4x8x8xf32> to vector<4x8xf32>
    %14 = vector.shape_cast %13 : vector<4x8xf32> to vector<4x8x1xf32>
    %15 = arith.maximumf %12, %14 : vector<4x8x1xf32>
    %16 = arith.subf %12, %15 : vector<4x8x1xf32>
    %17 = math.exp %16 : vector<4x8x1xf32>
    %18 = vector.broadcast %15 : vector<4x8x1xf32> to vector<4x8x8xf32>
    %19 = arith.subf %11, %18 : vector<4x8x8xf32>
    %20 = math.exp %19 : vector<4x8x8xf32>
    %c0_17 = arith.constant 0 : index
    %c0_18 = arith.constant 0 : index
    %c0_19 = arith.constant 0 : index
    %21 = vector.load %arg7[%c0_17, %c0_18, %c0_19] : memref<4x8x1xf32, #tpu.memory_space<vmem>>, vector<4x8x1xf32>
    %22 = arith.mulf %17, %21 : vector<4x8x1xf32>
    %cst_20 = arith.constant dense<0.000000e+00> : vector<4x8xf32>
    %23 = vector.multi_reduction <add>, %20, %cst_20 [2] : vector<4x8x8xf32> to vector<4x8xf32>
    %24 = vector.shape_cast %23 : vector<4x8xf32> to vector<4x8x1xf32>
    %25 = arith.addf %22, %24 : vector<4x8x1xf32>
    %c0_21 = arith.constant 0 : index
    %c0_22 = arith.constant 0 : index
    %c0_23 = arith.constant 0 : index
    %26 = vector.load %arg7[%c0_21, %c0_22, %c0_23] : memref<4x8x1xf32, #tpu.memory_space<vmem>>, vector<4x8x1xf32>
    tpu.vector_store %arg7[%c0_21, %c0_22, %c0_23], %25 {strides = array<i32>} : memref<4x8x1xf32, #tpu.memory_space<vmem>>, vector<4x8x1xf32>,
    %c0_24 = arith.constant 0 : index
    %c0_25 = arith.constant 0 : index
    %c0_26 = arith.constant 0 : index
    %27 = vector.load %arg8[%c0_24, %c0_25, %c0_26] : memref<4x8x8xf32, #tpu.memory_space<vmem>>, vector<4x8x8xf32>
    %28 = vector.broadcast %17 : vector<4x8x1xf32> to vector<4x8x8xf32>
    %29 = arith.mulf %28, %27 : vector<4x8x8xf32>
    "tpu.trace_start"() <{level = 10 : i32, message = "hqk,hkd->hqd"}> : () -> ()
    %cst_27 = arith.constant dense<0.000000e+00> : vector<4x8x8xf32>
    %30 = tpu.matmul %20, %8, %cst_27 {dimension_numbers = #tpu.dot_dimension_numbers<[2], [1], [1], [2], [0, 0, 0, 1, 1, 2], [0], [0]>} : vector<4x8x8xf32>, vector<4x8x8xf32>, vector<4x8x8xf32> -> vector<4x8x8xf32>
    "tpu.trace_stop"() : () -> ()
    %31 = arith.addf %29, %30 : vector<4x8x8xf32>
    %c0_28 = arith.constant 0 : index
    %c0_29 = arith.constant 0 : index
    %c0_30 = arith.constant 0 : index
    %32 = vector.load %arg8[%c0_28, %c0_29, %c0_30] : memref<4x8x8xf32, #tpu.memory_space<vmem>>, vector<4x8x8xf32>
    tpu.vector_store %arg8[%c0_28, %c0_29, %c0_30], %31 {strides = array<i32>} : memref<4x8x8xf32, #tpu.memory_space<vmem>>, vector<4x8x8xf32>,
    %c0_31 = arith.constant 0 : index
    %c0_32 = arith.constant 0 : index
    %c0_33 = arith.constant 0 : index
    %33 = vector.load %arg6[%c0_31, %c0_32, %c0_33] : memref<4x8x1xf32, #tpu.memory_space<vmem>>, vector<4x8x1xf32>
    tpu.vector_store %arg6[%c0_31, %c0_32, %c0_33], %15 {strides = array<i32>} : memref<4x8x1xf32, #tpu.memory_space<vmem>>, vector<4x8x1xf32>,
    %c0_i32_34 = arith.constant 0 : i32
    %34 = arith.cmpi eq, %arg1, %c0_i32_34 : i32
    %35 = arith.extui %34 : i1 to i32
    %c0_i32_35 = arith.constant 0 : i32
    %36 = arith.cmpi ne, %35, %c0_i32_35 : i32
    scf.if %36 {
      %c0_36 = arith.constant 0 : index
      %c0_37 = arith.constant 0 : index
      %c0_38 = arith.constant 0 : index
      %37 = vector.load %arg8[%c0_36, %c0_37, %c0_38] : memref<4x8x8xf32, #tpu.memory_space<vmem>>, vector<4x8x8xf32>
      %c0_39 = arith.constant 0 : index
      %c0_40 = arith.constant 0 : index
      %c0_41 = arith.constant 0 : index
      %38 = vector.load %arg7[%c0_39, %c0_40, %c0_41] : memref<4x8x1xf32, #tpu.memory_space<vmem>>, vector<4x8x1xf32>
      %39 = tpu.reciprocal %38 {approx = true} : vector<4x8x1xf32> -> vector<4x8x1xf32>
      %40 = vector.broadcast %39 : vector<4x8x1xf32> to vector<4x8x8xf32>
      %41 = arith.mulf %37, %40 : vector<4x8x8xf32>
      %c0_42 = arith.constant 0 : index
      %c0_43 = arith.constant 0 : index
      %c0_44 = arith.constant 0 : index
      %c0_45 = arith.constant 0 : index
      %42 = vector.load %arg5[%c0_42, %c0_43, %c0_44, %c0_45] : memref<1x4x8x8xf32, #tpu.memory_space<vmem>>, vector<1x4x8x8xf32>
      %43 = vector.shape_cast %42 : vector<1x4x8x8xf32> to vector<4x8x8xf32>
      %44 = vector.shape_cast %41 : vector<4x8x8xf32> to vector<1x4x8x8xf32>
      tpu.vector_store %arg5[%c0_42, %c0_43, %c0_44, %c0_45], %44 {strides = array<i32>} : memref<1x4x8x8xf32, #tpu.memory_space<vmem>>, vector<1x4x8x8xf32>,
    } else {
    }
    return
  }
  func.func @transform_0(%arg0: i32, %arg1: i32) -> (i32, i32, i32, i32) {
    %c0_i32 = arith.constant 0 : i32
    %c0_i32_0 = arith.constant 0 : i32
    %c0_i32_1 = arith.constant 0 : i32
    %c0_i32_2 = arith.constant 0 : i32
    return %arg0, %c0_i32, %c0_i32_0, %c0_i32_1 : i32, i32, i32, i32
  }
  func.func @transform_1(%arg0: i32, %arg1: i32) -> (i32, i32, i32, i32) {
    %c0_i32 = arith.constant 0 : i32
    %c0_i32_0 = arith.constant 0 : i32
    %c0_i32_1 = arith.constant 0 : i32
    return %arg0, %c0_i32, %arg1, %c0_i32_0 : i32, i32, i32, i32
  }
  func.func @transform_2(%arg0: i32, %arg1: i32) -> (i32, i32, i32, i32) {
    %c0_i32 = arith.constant 0 : i32
    %c0_i32_0 = arith.constant 0 : i32
    %c0_i32_1 = arith.constant 0 : i32
    return %arg0, %c0_i32, %arg1, %c0_i32_0 : i32, i32, i32, i32
  }
  func.func @transform_3(%arg0: i32, %arg1: i32) -> (i32, i32, i32, i32) {
    %c0_i32 = arith.constant 0 : i32
    %c0_i32_0 = arith.constant 0 : i32
    %c0_i32_1 = arith.constant 0 : i32
    %c0_i32_2 = arith.constant 0 : i32
    return %arg0, %c0_i32, %c0_i32_0, %c0_i32_1 : i32, i32, i32, i32
  }
}

module attributes {stable_mosaic.version = 11 : i64} {
  func.func @_matmul_kernel(%arg0: i32, %arg1: i32, %arg2: i32, %arg3: memref<16x32xf32, #tpu.memory_space<vmem>>, %arg4: memref<32x64xf32, #tpu.memory_space<vmem>>, %arg5: memref<1x64xf32, #tpu.memory_space<vmem>>, %arg6: memref<16x64xf32, #tpu.memory_space<vmem>>, %arg7: memref<16x64xf32, #tpu.memory_space<vmem>>) attributes {dimension_semantics = [#tpu.dimension_semantics<parallel>, #tpu.dimension_semantics<parallel>, #tpu.dimension_semantics<arbitrary>], iteration_bounds = array<i64: 1, 1, 1>, scalar_prefetch = 0 : i64, scratch_operands = 1 : i64, tpu.core_type = #tpu.core_type<tc>, window_params = [{transform_indices = @transform_0, window_bounds = array<i64: 16, 32>}, {transform_indices = @transform_1, window_bounds = array<i64: 32, 64>}, {transform_indices = @transform_2, window_bounds = array<i64: 1, 64>}, {transform_indices = @transform_3, window_bounds = array<i64: 16, 64>}]} {
    %c0_i32 = arith.constant 0 : i32
    %0 = arith.cmpi eq, %arg2, %c0_i32 : i32
    %1 = arith.extui %0 : i1 to i32
    %c0_i32_0 = arith.constant 0 : i32
    %2 = arith.cmpi ne, %1, %c0_i32_0 : i32
    scf.if %2 {
      %cst_10 = arith.constant 0.000000e+00 : f32
      %12 = vector.broadcast %cst_10 : f32 to vector<16x64xf32>
      %c0_11 = arith.constant 0 : index
      %c0_12 = arith.constant 0 : index
      %13 = vector.load %arg7[%c0_11, %c0_12] : memref<16x64xf32, #tpu.memory_space<vmem>>, vector<16x64xf32>
      tpu.vector_store %arg7[%c0_11, %c0_12], %12 {strides = array<i32>} : memref<16x64xf32, #tpu.memory_space<vmem>>, vector<16x64xf32>,
    } else {
    }
    %c0 = arith.constant 0 : index
    %c0_1 = arith.constant 0 : index
    %3 = vector.load %arg7[%c0, %c0_1] : memref<16x64xf32, #tpu.memory_space<vmem>>, vector<16x64xf32>
    %c0_2 = arith.constant 0 : index
    %c0_3 = arith.constant 0 : index
    %4 = vector.load %arg3[%c0_2, %c0_3] : memref<16x32xf32, #tpu.memory_space<vmem>>, vector<16x32xf32>
    %c0_4 = arith.constant 0 : index
    %c0_5 = arith.constant 0 : index
    %5 = vector.load %arg4[%c0_4, %c0_5] : memref<32x64xf32, #tpu.memory_space<vmem>>, vector<32x64xf32>
    %cst = arith.constant dense<0.000000e+00> : vector<16x64xf32>
    %6 = tpu.matmul %4, %5, %cst {dimension_numbers = #tpu.dot_dimension_numbers<[1], [0], [0], [1], [0, 0, 1, 1], [], []>} : vector<16x32xf32>, vector<32x64xf32>, vector<16x64xf32> -> vector<16x64xf32>
    %7 = arith.addf %3, %6 : vector<16x64xf32>
    %c0_6 = arith.constant 0 : index
    %c0_7 = arith.constant 0 : index
    %8 = vector.load %arg7[%c0_6, %c0_7] : memref<16x64xf32, #tpu.memory_space<vmem>>, vector<16x64xf32>
    tpu.vector_store %arg7[%c0_6, %c0_7], %7 {strides = array<i32>} : memref<16x64xf32, #tpu.memory_space<vmem>>, vector<16x64xf32>,
    %c0_i32_8 = arith.constant 0 : i32
    %9 = arith.cmpi eq, %arg2, %c0_i32_8 : i32
    %10 = arith.extui %9 : i1 to i32
    %c0_i32_9 = arith.constant 0 : i32
    %11 = arith.cmpi ne, %10, %c0_i32_9 : i32
    scf.if %11 {
      %c0_10 = arith.constant 0 : index
      %c0_11 = arith.constant 0 : index
      %12 = vector.load %arg7[%c0_10, %c0_11] : memref<16x64xf32, #tpu.memory_space<vmem>>, vector<16x64xf32>
      %c0_12 = arith.constant 0 : index
      %c0_13 = arith.constant 0 : index
      %13 = vector.load %arg5[%c0_12, %c0_13] : memref<1x64xf32, #tpu.memory_space<vmem>>, vector<1x64xf32>
      %14 = vector.broadcast %13 : vector<1x64xf32> to vector<16x64xf32>
      %15 = arith.addf %12, %14 : vector<16x64xf32>
      %cst_14 = arith.constant 0.000000e+00 : f32
      %16 = vector.broadcast %cst_14 : f32 to vector<16x64xf32>
      %17 = arith.maximumf %15, %16 : vector<16x64xf32>
      %c0_15 = arith.constant 0 : index
      %c0_16 = arith.constant 0 : index
      %18 = vector.load %arg6[%c0_15, %c0_16] : memref<16x64xf32, #tpu.memory_space<vmem>>, vector<16x64xf32>
      tpu.vector_store %arg6[%c0_15, %c0_16], %17 {strides = array<i32>} : memref<16x64xf32, #tpu.memory_space<vmem>>, vector<16x64xf32>,
    } else {
    }
    return
  }
  func.func @transform_0(%arg0: i32, %arg1: i32, %arg2: i32) -> (i32, i32) {
    %c0_i32 = arith.constant 0 : i32
    return %arg0, %arg2 : i32, i32
  }
  func.func @transform_1(%arg0: i32, %arg1: i32, %arg2: i32) -> (i32, i32) {
    %c0_i32 = arith.constant 0 : i32
    return %arg2, %arg1 : i32, i32
  }
  func.func @transform_2(%arg0: i32, %arg1: i32, %arg2: i32) -> (i32, i32) {
    %c0_i32 = arith.constant 0 : i32
    %c0_i32_0 = arith.constant 0 : i32
    return %c0_i32, %arg1 : i32, i32
  }
  func.func @transform_3(%arg0: i32, %arg1: i32, %arg2: i32) -> (i32, i32) {
    %c0_i32 = arith.constant 0 : i32
    return %arg0, %arg1 : i32, i32
  }
}

module attributes {stable_mosaic.version = 11 : i64} {
  func.func @_matmul_kernel(%arg0: i32, %arg1: i32, %arg2: i32, %arg3: memref<16x64xf32, #tpu.memory_space<vmem>>, %arg4: memref<64x32xf32, #tpu.memory_space<vmem>>, %arg5: memref<1x32xf32, #tpu.memory_space<vmem>>, %arg6: memref<16x32xf32, #tpu.memory_space<vmem>>, %arg7: memref<16x32xf32, #tpu.memory_space<vmem>>) attributes {dimension_semantics = [#tpu.dimension_semantics<parallel>, #tpu.dimension_semantics<parallel>, #tpu.dimension_semantics<arbitrary>], iteration_bounds = array<i64: 1, 1, 1>, scalar_prefetch = 0 : i64, scratch_operands = 1 : i64, tpu.core_type = #tpu.core_type<tc>, window_params = [{transform_indices = @transform_0, window_bounds = array<i64: 16, 64>}, {transform_indices = @transform_1, window_bounds = array<i64: 64, 32>}, {transform_indices = @transform_2, window_bounds = array<i64: 1, 32>}, {transform_indices = @transform_3, window_bounds = array<i64: 16, 32>}]} {
    %c0_i32 = arith.constant 0 : i32
    %0 = arith.cmpi eq, %arg2, %c0_i32 : i32
    %1 = arith.extui %0 : i1 to i32
    %c0_i32_0 = arith.constant 0 : i32
    %2 = arith.cmpi ne, %1, %c0_i32_0 : i32
    scf.if %2 {
      %cst_10 = arith.constant 0.000000e+00 : f32
      %12 = vector.broadcast %cst_10 : f32 to vector<16x32xf32>
      %c0_11 = arith.constant 0 : index
      %c0_12 = arith.constant 0 : index
      %13 = vector.load %arg7[%c0_11, %c0_12] : memref<16x32xf32, #tpu.memory_space<vmem>>, vector<16x32xf32>
      tpu.vector_store %arg7[%c0_11, %c0_12], %12 {strides = array<i32>} : memref<16x32xf32, #tpu.memory_space<vmem>>, vector<16x32xf32>,
    } else {
    }
    %c0 = arith.constant 0 : index
    %c0_1 = arith.constant 0 : index
    %3 = vector.load %arg7[%c0, %c0_1] : memref<16x32xf32, #tpu.memory_space<vmem>>, vector<16x32xf32>
    %c0_2 = arith.constant 0 : index
    %c0_3 = arith.constant 0 : index
    %4 = vector.load %arg3[%c0_2, %c0_3] : memref<16x64xf32, #tpu.memory_space<vmem>>, vector<16x64xf32>
    %c0_4 = arith.constant 0 : index
    %c0_5 = arith.constant 0 : index
    %5 = vector.load %arg4[%c0_4, %c0_5] : memref<64x32xf32, #tpu.memory_space<vmem>>, vector<64x32xf32>
    %cst = arith.constant dense<0.000000e+00> : vector<16x32xf32>
    %6 = tpu.matmul %4, %5, %cst {dimension_numbers = #tpu.dot_dimension_numbers<[1], [0], [0], [1], [0, 0, 1, 1], [], []>} : vector<16x64xf32>, vector<64x32xf32>, vector<16x32xf32> -> vector<16x32xf32>
    %7 = arith.addf %3, %6 : vector<16x32xf32>
    %c0_6 = arith.constant 0 : index
    %c0_7 = arith.constant 0 : index
    %8 = vector.load %arg7[%c0_6, %c0_7] : memref<16x32xf32, #tpu.memory_space<vmem>>, vector<16x32xf32>
    tpu.vector_store %arg7[%c0_6, %c0_7], %7 {strides = array<i32>} : memref<16x32xf32, #tpu.memory_space<vmem>>, vector<16x32xf32>,
    %c0_i32_8 = arith.constant 0 : i32
    %9 = arith.cmpi eq, %arg2, %c0_i32_8 : i32
    %10 = arith.extui %9 : i1 to i32
    %c0_i32_9 = arith.constant 0 : i32
    %11 = arith.cmpi ne, %10, %c0_i32_9 : i32
    scf.if %11 {
      %c0_10 = arith.constant 0 : index
      %c0_11 = arith.constant 0 : index
      %12 = vector.load %arg7[%c0_10, %c0_11] : memref<16x32xf32, #tpu.memory_space<vmem>>, vector<16x32xf32>
      %c0_12 = arith.constant 0 : index
      %c0_13 = arith.constant 0 : index
      %13 = vector.load %arg5[%c0_12, %c0_13] : memref<1x32xf32, #tpu.memory_space<vmem>>, vector<1x32xf32>
      %14 = vector.broadcast %13 : vector<1x32xf32> to vector<16x32xf32>
      %15 = arith.addf %12, %14 : vector<16x32xf32>
      %c0_14 = arith.constant 0 : index
      %c0_15 = arith.constant 0 : index
      %16 = vector.load %arg6[%c0_14, %c0_15] : memref<16x32xf32, #tpu.memory_space<vmem>>, vector<16x32xf32>
      tpu.vector_store %arg6[%c0_14, %c0_15], %15 {strides = array<i32>} : memref<16x32xf32, #tpu.memory_space<vmem>>, vector<16x32xf32>,
    } else {
    }
    return
  }
  func.func @transform_0(%arg0: i32, %arg1: i32, %arg2: i32) -> (i32, i32) {
    %c0_i32 = arith.constant 0 : i32
    return %arg0, %arg2 : i32, i32
  }
  func.func @transform_1(%arg0: i32, %arg1: i32, %arg2: i32) -> (i32, i32) {
    %c0_i32 = arith.constant 0 : i32
    return %arg2, %arg1 : i32, i32
  }
  func.func @transform_2(%arg0: i32, %arg1: i32, %arg2: i32) -> (i32, i32) {
    %c0_i32 = arith.constant 0 : i32
    %c0_i32_0 = arith.constant 0 : i32
    return %c0_i32, %arg1 : i32, i32
  }
  func.func @transform_3(%arg0: i32, %arg1: i32, %arg2: i32) -> (i32, i32) {
    %c0_i32 = arith.constant 0 : i32
    return %arg0, %arg1 : i32, i32
  }
}

module attributes {stable_mosaic.version = 11 : i64} {
  func.func @_layernorm_kernel(%arg0: i32, %arg1: memref<16x32xf32, #tpu.memory_space<vmem>>, %arg2: memref<1x32xf32, #tpu.memory_space<vmem>>, %arg3: memref<1x32xf32, #tpu.memory_space<vmem>>, %arg4: memref<16x32xf32, #tpu.memory_space<vmem>>) attributes {dimension_semantics = [#tpu.dimension_semantics<parallel>], iteration_bounds = array<i64: 1>, scalar_prefetch = 0 : i64, scratch_operands = 0 : i64, tpu.core_type = #tpu.core_type<tc>, window_params = [{transform_indices = @transform_0, window_bounds = array<i64: 16, 32>}, {pipeline_mode = #tpu.pipeline_mode<synchronous>, transform_indices = @transform_1, window_bounds = array<i64: 1, 32>}, {pipeline_mode = #tpu.pipeline_mode<synchronous>, transform_indices = @transform_2, window_bounds = array<i64: 1, 32>}, {transform_indices = @transform_3, window_bounds = array<i64: 16, 32>}]} {
    %c0 = arith.constant 0 : index
    %c0_0 = arith.constant 0 : index
    %0 = vector.load %arg1[%c0, %c0_0] : memref<16x32xf32, #tpu.memory_space<vmem>>, vector<16x32xf32>
    %cst = arith.constant dense<0.000000e+00> : vector<16xf32>
    %1 = vector.multi_reduction <add>, %0, %cst [1] : vector<16x32xf32> to vector<16xf32>
    %2 = vector.shape_cast %1 : vector<16xf32> to vector<16x1xf32>
    %cst_1 = arith.constant 3.200000e+01 : f32
    %3 = vector.broadcast %cst_1 : f32 to vector<16x1xf32>
    %4 = arith.divf %2, %3 : vector<16x1xf32>
    %5 = vector.broadcast %4 : vector<16x1xf32> to vector<16x32xf32>
    %6 = arith.subf %0, %5 : vector<16x32xf32>
    %7 = arith.mulf %6, %6 : vector<16x32xf32>
    %cst_2 = arith.constant dense<0.000000e+00> : vector<16xf32>
    %8 = vector.multi_reduction <add>, %7, %cst_2 [1] : vector<16x32xf32> to vector<16xf32>
    %9 = vector.shape_cast %8 : vector<16xf32> to vector<16x1xf32>
    %cst_3 = arith.constant 3.200000e+01 : f32
    %10 = vector.broadcast %cst_3 : f32 to vector<16x1xf32>
    %11 = arith.divf %9, %10 : vector<16x1xf32>
    %12 = vector.broadcast %4 : vector<16x1xf32> to vector<16x32xf32>
    %13 = arith.subf %0, %12 : vector<16x32xf32>
    %cst_4 = arith.constant 9.99999974E-6 : f32
    %14 = vector.broadcast %cst_4 : f32 to vector<16x1xf32>
    %15 = arith.addf %11, %14 : vector<16x1xf32>
    %16 = math.rsqrt %15 : vector<16x1xf32>
    %17 = vector.broadcast %16 : vector<16x1xf32> to vector<16x32xf32>
    %18 = arith.mulf %13, %17 : vector<16x32xf32>
    %c0_5 = arith.constant 0 : index
    %c0_6 = arith.constant 0 : index
    %19 = vector.load %arg2[%c0_5, %c0_6] : memref<1x32xf32, #tpu.memory_space<vmem>>, vector<1x32xf32>
    %20 = vector.broadcast %19 : vector<1x32xf32> to vector<16x32xf32>
    %21 = arith.mulf %18, %20 : vector<16x32xf32>
    %c0_7 = arith.constant 0 : index
    %c0_8 = arith.constant 0 : index
    %22 = vector.load %arg3[%c0_7, %c0_8] : memref<1x32xf32, #tpu.memory_space<vmem>>, vector<1x32xf32>
    %23 = vector.broadcast %22 : vector<1x32xf32> to vector<16x32xf32>
    %24 = arith.addf %21, %23 : vector<16x32xf32>
    %c0_9 = arith.constant 0 : index
    %c0_10 = arith.constant 0 : index
    %25 = vector.load %arg4[%c0_9, %c0_10] : memref<16x32xf32, #tpu.memory_space<vmem>>, vector<16x32xf32>
    tpu.vector_store %arg4[%c0_9, %c0_10], %24 {strides = array<i32>} : memref<16x32xf32, #tpu.memory_space<vmem>>, vector<16x32xf32>,
    return
  }
  func.func @transform_0(%arg0: i32) -> (i32, i32) {
    %c0_i32 = arith.constant 0 : i32
    %c0_i32_0 = arith.constant 0 : i32
    return %arg0, %c0_i32 : i32, i32
  }
  func.func @transform_1(%arg0: i32) -> (i32, i32) {
    %c0_i32 = arith.constant 0 : i32
    %c0_i32_0 = arith.constant 0 : i32
    %c0_i32_1 = arith.constant 0 : i32
    return %c0_i32, %c0_i32_0 : i32, i32
  }
  func.func @transform_2(%arg0: i32) -> (i32, i32) {
    %c0_i32 = arith.constant 0 : i32
    %c0_i32_0 = arith.constant 0 : i32
    %c0_i32_1 = arith.constant 0 : i32
    return %c0_i32, %c0_i32_0 : i32, i32
  }
  func.func @transform_3(%arg0: i32) -> (i32, i32) {
    %c0_i32 = arith.constant 0 : i32
    %c0_i32_0 = arith.constant 0 : i32
    return %arg0, %c0_i32 : i32, i32
  }
}

module attributes {stable_mosaic.version = 11 : i64} {
  func.func @_matmul_kernel(%arg0: i32, %arg1: i32, %arg2: i32, %arg3: memref<16x32xf32, #tpu.memory_space<vmem>>, %arg4: memref<32x64xf32, #tpu.memory_space<vmem>>, %arg5: memref<1x64xf32, #tpu.memory_space<vmem>>, %arg6: memref<16x64xf32, #tpu.memory_space<vmem>>, %arg7: memref<16x64xf32, #tpu.memory_space<vmem>>) attributes {dimension_semantics = [#tpu.dimension_semantics<parallel>, #tpu.dimension_semantics<parallel>, #tpu.dimension_semantics<arbitrary>], iteration_bounds = array<i64: 1, 1, 1>, scalar_prefetch = 0 : i64, scratch_operands = 1 : i64, tpu.core_type = #tpu.core_type<tc>, window_params = [{transform_indices = @transform_0, window_bounds = array<i64: 16, 32>}, {transform_indices = @transform_1, window_bounds = array<i64: 32, 64>}, {transform_indices = @transform_2, window_bounds = array<i64: 1, 64>}, {transform_indices = @transform_3, window_bounds = array<i64: 16, 64>}]} {
    %c0_i32 = arith.constant 0 : i32
    %0 = arith.cmpi eq, %arg2, %c0_i32 : i32
    %1 = arith.extui %0 : i1 to i32
    %c0_i32_0 = arith.constant 0 : i32
    %2 = arith.cmpi ne, %1, %c0_i32_0 : i32
    scf.if %2 {
      %cst_10 = arith.constant 0.000000e+00 : f32
      %12 = vector.broadcast %cst_10 : f32 to vector<16x64xf32>
      %c0_11 = arith.constant 0 : index
      %c0_12 = arith.constant 0 : index
      %13 = vector.load %arg7[%c0_11, %c0_12] : memref<16x64xf32, #tpu.memory_space<vmem>>, vector<16x64xf32>
      tpu.vector_store %arg7[%c0_11, %c0_12], %12 {strides = array<i32>} : memref<16x64xf32, #tpu.memory_space<vmem>>, vector<16x64xf32>,
    } else {
    }
    %c0 = arith.constant 0 : index
    %c0_1 = arith.constant 0 : index
    %3 = vector.load %arg7[%c0, %c0_1] : memref<16x64xf32, #tpu.memory_space<vmem>>, vector<16x64xf32>
    %c0_2 = arith.constant 0 : index
    %c0_3 = arith.constant 0 : index
    %4 = vector.load %arg3[%c0_2, %c0_3] : memref<16x32xf32, #tpu.memory_space<vmem>>, vector<16x32xf32>
    %c0_4 = arith.constant 0 : index
    %c0_5 = arith.constant 0 : index
    %5 = vector.load %arg4[%c0_4, %c0_5] : memref<32x64xf32, #tpu.memory_space<vmem>>, vector<32x64xf32>
    %cst = arith.constant dense<0.000000e+00> : vector<16x64xf32>
    %6 = tpu.matmul %4, %5, %cst {dimension_numbers = #tpu.dot_dimension_numbers<[1], [0], [0], [1], [0, 0, 1, 1], [], []>} : vector<16x32xf32>, vector<32x64xf32>, vector<16x64xf32> -> vector<16x64xf32>
    %7 = arith.addf %3, %6 : vector<16x64xf32>
    %c0_6 = arith.constant 0 : index
    %c0_7 = arith.constant 0 : index
    %8 = vector.load %arg7[%c0_6, %c0_7] : memref<16x64xf32, #tpu.memory_space<vmem>>, vector<16x64xf32>
    tpu.vector_store %arg7[%c0_6, %c0_7], %7 {strides = array<i32>} : memref<16x64xf32, #tpu.memory_space<vmem>>, vector<16x64xf32>,
    %c0_i32_8 = arith.constant 0 : i32
    %9 = arith.cmpi eq, %arg2, %c0_i32_8 : i32
    %10 = arith.extui %9 : i1 to i32
    %c0_i32_9 = arith.constant 0 : i32
    %11 = arith.cmpi ne, %10, %c0_i32_9 : i32
    scf.if %11 {
      %c0_10 = arith.constant 0 : index
      %c0_11 = arith.constant 0 : index
      %12 = vector.load %arg7[%c0_10, %c0_11] : memref<16x64xf32, #tpu.memory_space<vmem>>, vector<16x64xf32>
      %c0_12 = arith.constant 0 : index
      %c0_13 = arith.constant 0 : index
      %13 = vector.load %arg5[%c0_12, %c0_13] : memref<1x64xf32, #tpu.memory_space<vmem>>, vector<1x64xf32>
      %14 = vector.broadcast %13 : vector<1x64xf32> to vector<16x64xf32>
      %15 = arith.addf %12, %14 : vector<16x64xf32>
      %c0_14 = arith.constant 0 : index
      %c0_15 = arith.constant 0 : index
      %16 = vector.load %arg6[%c0_14, %c0_15] : memref<16x64xf32, #tpu.memory_space<vmem>>, vector<16x64xf32>
      tpu.vector_store %arg6[%c0_14, %c0_15], %15 {strides = array<i32>} : memref<16x64xf32, #tpu.memory_space<vmem>>, vector<16x64xf32>,
    } else {
    }
    return
  }
  func.func @transform_0(%arg0: i32, %arg1: i32, %arg2: i32) -> (i32, i32) {
    %c0_i32 = arith.constant 0 : i32
    return %arg0, %arg2 : i32, i32
  }
  func.func @transform_1(%arg0: i32, %arg1: i32, %arg2: i32) -> (i32, i32) {
    %c0_i32 = arith.constant 0 : i32
    return %arg2, %arg1 : i32, i32
  }
  func.func @transform_2(%arg0: i32, %arg1: i32, %arg2: i32) -> (i32, i32) {
    %c0_i32 = arith.constant 0 : i32
    %c0_i32_0 = arith.constant 0 : i32
    return %c0_i32, %arg1 : i32, i32
  }
  func.func @transform_3(%arg0: i32, %arg1: i32, %arg2: i32) -> (i32, i32) {
    %c0_i32 = arith.constant 0 : i32
    return %arg0, %arg1 : i32, i32
  }
}

module attributes {stable_mosaic.version = 11 : i64} {
  func.func @_matmul_kernel(%arg0: i32, %arg1: i32, %arg2: i32, %arg3: memref<16x32xf32, #tpu.memory_space<vmem>>, %arg4: memref<32x16xf32, #tpu.memory_space<vmem>>, %arg5: memref<1x16xf32, #tpu.memory_space<vmem>>, %arg6: memref<16x16xf32, #tpu.memory_space<vmem>>, %arg7: memref<16x16xf32, #tpu.memory_space<vmem>>) attributes {dimension_semantics = [#tpu.dimension_semantics<parallel>, #tpu.dimension_semantics<parallel>, #tpu.dimension_semantics<arbitrary>], iteration_bounds = array<i64: 1, 1, 1>, scalar_prefetch = 0 : i64, scratch_operands = 1 : i64, tpu.core_type = #tpu.core_type<tc>, window_params = [{transform_indices = @transform_0, window_bounds = array<i64: 16, 32>}, {transform_indices = @transform_1, window_bounds = array<i64: 32, 16>}, {transform_indices = @transform_2, window_bounds = array<i64: 1, 16>}, {transform_indices = @transform_3, window_bounds = array<i64: 16, 16>}]} {
    %c0_i32 = arith.constant 0 : i32
    %0 = arith.cmpi eq, %arg2, %c0_i32 : i32
    %1 = arith.extui %0 : i1 to i32
    %c0_i32_0 = arith.constant 0 : i32
    %2 = arith.cmpi ne, %1, %c0_i32_0 : i32
    scf.if %2 {
      %cst_10 = arith.constant 0.000000e+00 : f32
      %12 = vector.broadcast %cst_10 : f32 to vector<16x16xf32>
      %c0_11 = arith.constant 0 : index
      %c0_12 = arith.constant 0 : index
      %13 = vector.load %arg7[%c0_11, %c0_12] : memref<16x16xf32, #tpu.memory_space<vmem>>, vector<16x16xf32>
      tpu.vector_store %arg7[%c0_11, %c0_12], %12 {strides = array<i32>} : memref<16x16xf32, #tpu.memory_space<vmem>>, vector<16x16xf32>,
    } else {
    }
    %c0 = arith.constant 0 : index
    %c0_1 = arith.constant 0 : index
    %3 = vector.load %arg7[%c0, %c0_1] : memref<16x16xf32, #tpu.memory_space<vmem>>, vector<16x16xf32>
    %c0_2 = arith.constant 0 : index
    %c0_3 = arith.constant 0 : index
    %4 = vector.load %arg3[%c0_2, %c0_3] : memref<16x32xf32, #tpu.memory_space<vmem>>, vector<16x32xf32>
    %c0_4 = arith.constant 0 : index
    %c0_5 = arith.constant 0 : index
    %5 = vector.load %arg4[%c0_4, %c0_5] : memref<32x16xf32, #tpu.memory_space<vmem>>, vector<32x16xf32>
    %cst = arith.constant dense<0.000000e+00> : vector<16x16xf32>
    %6 = tpu.matmul %4, %5, %cst {dimension_numbers = #tpu.dot_dimension_numbers<[1], [0], [0], [1], [0, 0, 1, 1], [], []>} : vector<16x32xf32>, vector<32x16xf32>, vector<16x16xf32> -> vector<16x16xf32>
    %7 = arith.addf %3, %6 : vector<16x16xf32>
    %c0_6 = arith.constant 0 : index
    %c0_7 = arith.constant 0 : index
    %8 = vector.load %arg7[%c0_6, %c0_7] : memref<16x16xf32, #tpu.memory_space<vmem>>, vector<16x16xf32>
    tpu.vector_store %arg7[%c0_6, %c0_7], %7 {strides = array<i32>} : memref<16x16xf32, #tpu.memory_space<vmem>>, vector<16x16xf32>,
    %c0_i32_8 = arith.constant 0 : i32
    %9 = arith.cmpi eq, %arg2, %c0_i32_8 : i32
    %10 = arith.extui %9 : i1 to i32
    %c0_i32_9 = arith.constant 0 : i32
    %11 = arith.cmpi ne, %10, %c0_i32_9 : i32
    scf.if %11 {
      %c0_10 = arith.constant 0 : index
      %c0_11 = arith.constant 0 : index
      %12 = vector.load %arg7[%c0_10, %c0_11] : memref<16x16xf32, #tpu.memory_space<vmem>>, vector<16x16xf32>
      %c0_12 = arith.constant 0 : index
      %c0_13 = arith.constant 0 : index
      %13 = vector.load %arg5[%c0_12, %c0_13] : memref<1x16xf32, #tpu.memory_space<vmem>>, vector<1x16xf32>
      %14 = vector.broadcast %13 : vector<1x16xf32> to vector<16x16xf32>
      %15 = arith.addf %12, %14 : vector<16x16xf32>
      %c0_14 = arith.constant 0 : index
      %c0_15 = arith.constant 0 : index
      %16 = vector.load %arg6[%c0_14, %c0_15] : memref<16x16xf32, #tpu.memory_space<vmem>>, vector<16x16xf32>
      tpu.vector_store %arg6[%c0_14, %c0_15], %15 {strides = array<i32>} : memref<16x16xf32, #tpu.memory_space<vmem>>, vector<16x16xf32>,
    } else {
    }
    return
  }
  func.func @transform_0(%arg0: i32, %arg1: i32, %arg2: i32) -> (i32, i32) {
    %c0_i32 = arith.constant 0 : i32
    return %arg0, %arg2 : i32, i32
  }
  func.func @transform_1(%arg0: i32, %arg1: i32, %arg2: i32) -> (i32, i32) {
    %c0_i32 = arith.constant 0 : i32
    return %arg2, %arg1 : i32, i32
  }
  func.func @transform_2(%arg0: i32, %arg1: i32, %arg2: i32) -> (i32, i32) {
    %c0_i32 = arith.constant 0 : i32
    %c0_i32_0 = arith.constant 0 : i32
    return %c0_i32, %arg1 : i32, i32
  }
  func.func @transform_3(%arg0: i32, %arg1: i32, %arg2: i32) -> (i32, i32) {
    %c0_i32 = arith.constant 0 : i32
    return %arg0, %arg1 : i32, i32
  }
}

</mosaic_0001>

<bundles_post_ra>
// kernel: transformer_forward.58
= control target key start
LH: loop header
LB: loop body
LE: loop exit
PB: predicated region body
PF: predicated region fallthrough
CT: control target
= control target key end

     0   :  { %vm18_vm0 = vcmask 261120   ;;  %v164_v3 = vmov 0.0   ;;  %s220_s1 = inlined_call_operand.vmem [shape: f32[32,32], index: 1, kind: input, shape index: {}]   ;;  %s221_s0 = inlined_call_operand.vmem [shape: f32[16,32], index: 0, kind: input, shape index: {}]   ;;  %s222_s2 = inlined_call_operand.vmem [shape: f32[1,32], index: 2, kind: input, shape index: {}]   ;;  %s223_s3 = inlined_call_operand.vmem [shape: f32[16,32], index: 3, kind: output, shape index: {}]  }
   0x1   :  { %v25_v0 = vld [vmem:[%s220_s1] sm:$0xff]  ;;  %v26_v1 = vld [vmem:[%s220_s1 + $0x8] sm:$0xff]  ;;  %v27_v2 = vld [vmem:[%s220_s1 + $0x10] sm:$0xff]  ;;  %20 = vst.msk [vmem:[#allocation2 + $0x8] sm:$0xff] %vm18_vm0, %v164_v3 }
   0x2   :  { %19 = vst.msk [vmem:[#allocation2] sm:$0xff] %vm18_vm0, %v164_v3  ;;  %v155_v4 = vpack.c.bf16 %v26_v1, %v25_v0  ;;  %v28_v5 = vld [vmem:[%s220_s1 + $0x18] sm:$0xff]  ;;  %v23_v6 = vld [vmem:[%s221_s0] sm:$0xff]  ;;  %v24_v8 = vld [vmem:[%s221_s0 + $0x8] sm:$0xff] }
   0x3   :  { %v159_v7 = vpack.c.bf16 %v28_v5, %v27_v2  ;;  %152 = vmatprep.mubr.msk.f32.mxu0 %vm18_vm0, %v23_v6  ;;  %v137_v15 = vld [vmem:[%s222_s2] ss:$0 sm:$0xff] }
   0x4   :  { %156 = vmatprep.subr.bf16.mxu0 %v155_v4 }
   0x5   :  { %158 = vmatpush3.bf16.msra.mxu0 %v155_v4 }
   0x6   :  { %160 = vmatprep.subr.bf16.mxu0 %v159_v7 }
   0x8   :  { %v22_v9 = vld [vmem:[#allocation2 + $0x8] sm:$0xff] }
   0x9   :  { %162 = vmatpush3.bf16.msra.mxu0 %v159_v7  ;;  %v21_v10 = vld [vmem:[#allocation2] sm:$0xff] }
   0xc   :  { %153 = vmatmul.mubr.msk.f32.vlgmr.msra.gmra.mrb[0].mxu0 %vm18_vm0, %v24_v8 }
  0xdf   :  { %v154_v11 = vpop.f32.mrb[0].mxu0 }
  0xe0   :  { %v112_v12 = vadd.f32 %v154_v11, %v22_v9  ;;  %v102_v13 = vpop.f32.mrb[1].mxu0 }
  0xe1   :  { %v111_v14 = vadd.f32 %v102_v13, %v21_v10 }
  0xe2   :  { %114 = vst.msk [vmem:[#allocation2 + $0x8] sm:$0xff] %vm18_vm0, %v112_v12 }
  0xe3   :  { %113 = vst.msk [vmem:[#allocation2] sm:$0xff] %vm18_vm0, %v111_v14 }
  0xe9   :  { %v119_v16 = vld [vmem:[#allocation2 + $0x8] sm:$0xff] }
  0xea   :  { %v128_v17 = vadd.f32 %v137_v15, %v119_v16  ;;  %v118_v18 = vld [vmem:[#allocation2] sm:$0xff] }
  0xeb   :  { %v127_v19 = vadd.f32 %v137_v15, %v118_v18 }
  0xec   :  { %130 = vst.msk [vmem:[%s223_s3 + $0x8] sm:$0xff] %vm18_vm0, %v128_v17 }
  0xed   :  { %129 = vst.msk [vmem:[%s223_s3] sm:$0xff] %vm18_vm0, %v127_v19 }

// kernel: transformer_forward.56
= control target key start
LH: loop header
LB: loop body
LE: loop exit
PB: predicated region body
PF: predicated region fallthrough
CT: control target
= control target key end

     0   :  { %vm29_vm0 = vcmask 261120   ;;  %vm18_vm1 = vcmask 785408   ;;  %v165_v3 = vmov 0.0   ;;  %s221_s1 = inlined_call_operand.vmem [shape: f32[32,96], index: 1, kind: input, shape index: {}]   ;;  %s222_s0 = inlined_call_operand.vmem [shape: f32[16,32], index: 0, kind: input, shape index: {}]   ;;  %s223_s2 = inlined_call_operand.vmem [shape: f32[1,96], index: 2, kind: input, shape index: {}]   ;;  %s224_s3 = inlined_call_operand.vmem [shape: f32[16,96], index: 3, kind: output, shape index: {}]  }
   0x1   :  { %v25_v0 = vld [vmem:[%s221_s1] sm:$0xff]  ;;  %v26_v1 = vld [vmem:[%s221_s1 + $0x8] sm:$0xff]  ;;  %v27_v2 = vld [vmem:[%s221_s1 + $0x10] sm:$0xff]  ;;  %20 = vst.msk [vmem:[#allocation2 + $0x8] sm:$0xff] %vm18_vm1, %v165_v3 }
   0x2   :  { %19 = vst.msk [vmem:[#allocation2] sm:$0xff] %vm18_vm1, %v165_v3  ;;  %v156_v4 = vpack.c.bf16 %v26_v1, %v25_v0  ;;  %v28_v5 = vld [vmem:[%s221_s1 + $0x18] sm:$0xff]  ;;  %v23_v6 = vld [vmem:[%s222_s0] sm:$0xff]  ;;  %v24_v8 = vld [vmem:[%s222_s0 + $0x8] sm:$0xff] }
   0x3   :  { %v160_v7 = vpack.c.bf16 %v28_v5, %v27_v2  ;;  %153 = vmatprep.mubr.msk.f32.mxu0 %vm29_vm0, %v23_v6  ;;  %v138_v15 = vld [vmem:[%s223_s2] ss:$0 sm:$0xff] }
   0x4   :  { %157 = vmatprep.subr.bf16.mxu0 %v156_v4 }
   0x5   :  { %159 = vmatpush3.bf16.msra.mxu0 %v156_v4 }
   0x6   :  { %161 = vmatprep.subr.bf16.mxu0 %v160_v7 }
   0x8   :  { %v22_v9 = vld [vmem:[#allocation2 + $0x8] sm:$0xff] }
   0x9   :  { %163 = vmatpush3.bf16.msra.mxu0 %v160_v7  ;;  %v21_v10 = vld [vmem:[#allocation2] sm:$0xff] }
   0xc   :  { %154 = vmatmul.mubr.msk.f32.vlgmr.msra.gmra.mrb[0].mxu0 %vm29_vm0, %v24_v8 }
  0xdf   :  { %v155_v11 = vpop.f32.mrb[0].mxu0 }
  0xe0   :  { %v112_v12 = vadd.f32 %v155_v11, %v22_v9  ;;  %v102_v13 = vpop.f32.mrb[1].mxu0 }
  0xe1   :  { %v111_v14 = vadd.f32 %v102_v13, %v21_v10 }
  0xe2   :  { %115 = vst.msk [vmem:[#allocation2 + $0x8] sm:$0xff] %vm18_vm1, %v112_v12 }
  0xe3   :  { %114 = vst.msk [vmem:[#allocation2] sm:$0xff] %vm18_vm1, %v111_v14 }
  0xe9   :  { %v120_v16 = vld [vmem:[#allocation2 + $0x8] sm:$0xff] }
  0xea   :  { %v129_v17 = vadd.f32 %v138_v15, %v120_v16  ;;  %v119_v18 = vld [vmem:[#allocation2] sm:$0xff] }
  0xeb   :  { %v128_v19 = vadd.f32 %v138_v15, %v119_v18 }
  0xec   :  { %131 = vst.msk [vmem:[%s224_s3 + $0x8] sm:$0xff] %vm18_vm1, %v129_v17 }
  0xed   :  { %130 = vst.msk [vmem:[%s224_s3] sm:$0xff] %vm18_vm1, %v128_v19 }

// kernel: transformer_forward.59
= control target key start
LH: loop header
LB: loop body
LE: loop exit
PB: predicated region body
PF: predicated region fallthrough
CT: control target
= control target key end

     0   :  { %vm23_vm0 = vcmask 261120   ;;  %s136_s0 = inlined_call_operand.vmem [shape: f32[16,32], index: 0, kind: input, shape index: {}]   ;;  %s137_s1 = inlined_call_operand.vmem [shape: f32[16,32], index: 1, kind: input, shape index: {}]   ;;  %s138_s2 = inlined_call_operand.vmem [shape: f32[1,32], index: 2, kind: input, shape index: {}]   ;;  %s139_s3 = inlined_call_operand.vmem [shape: f32[1,32], index: 3, kind: input, shape index: {}]   ;;  %s140_s4 = inlined_call_operand.vmem [shape: f32[16,32], index: 4, kind: output, shape index: {}]  }
   0x1   :  { %v17_v0 = vld [vmem:[%s136_s0] sm:$0xff]  ;;  %v18_v2 = vld [vmem:[%s136_s0 + $0x8] sm:$0xff] }
   0x2   :  { %v19_v1 = vld [vmem:[%s137_s1] sm:$0xff]  ;;  %v20_v4 = vld [vmem:[%s137_s1 + $0x8] sm:$0xff] }
   0x3   :  { %v21_v3 = vadd.f32 %v19_v1, %v17_v0  ;;  %v22_v5 = vadd.f32 %v20_v4, %v18_v2  ;;  %v75_v25 = vld [vmem:[%s138_s2] ss:$0 sm:$0xff] }
   0x4   :  { %v76_v27 = vld [vmem:[%s139_s3] ss:$0 sm:$0xff] }
   0x5   :  { %v24_v6 = vsel %vm23_vm0, %v21_v3, 0.0  ;;  %v27_v7 = vsel %vm23_vm0, %v22_v5, 0.0 }
   0x6   :  { %25 = vadd.xlane.f32.xlu0 %v24_v6 }
   0xa   :  { %28 = vadd.xlane.f32.xlu0 %v27_v7 }
  0x93   :  { %v26_v8 = vpop.xlane.xlu0 %25 }
  0x94   :  { %v31_v9 = vmul.f32 0.03125, %v26_v8 }
  0x96   :  { %v33_v10 = vsub.f32 %v21_v3, %v31_v9 }
  0x97   :  { %v29_v11 = vpop.xlane.xlu0 %28 }
  0x98   :  { %v32_v12 = vmul.f32 0.03125, %v29_v11  ;;  %v35_v13 = vmul.f32 %v33_v10, %v33_v10 }
  0x9a   :  { %v34_v14 = vsub.f32 %v22_v5, %v32_v12  ;;  %v37_v15 = vsel %vm23_vm0, %v35_v13, 0.0 }
  0x9b   :  { %38 = vadd.xlane.f32.xlu1 %v37_v15 }
  0x9c   :  { %v36_v16 = vmul.f32 %v34_v14, %v34_v14 }
  0x9e   :  { %v40_v17 = vsel %vm23_vm0, %v36_v16, 0.0 }
  0x9f   :  { %41 = vadd.xlane.f32.xlu1 %v40_v17 }
 0x128   :  { %v39_v18 = vpop.xlane.xlu1 %38 }
 0x129   :  { %v43_v19 = vmul.f32 0.03125, %v39_v18 }
 0x12b   :  { %v45_v20 = vadd.f32 1e-05, %v43_v19 }
 0x12c   :  { %v42_v21 = vpop.xlane.xlu1 %41 }
 0x12d   :  { %77 = vrsqrt.f32 %v45_v20  ;;  %v44_v22 = vmul.f32 0.03125, %v42_v21 }
 0x12f   :  { %v46_v23 = vadd.f32 1e-05, %v44_v22 }
 0x131   :  { %79 = vrsqrt.f32 %v46_v23 }
 0x137   :  { %v78_v24 = vpop.eup %77 }
 0x138   :  { %v49_v26 = vmul.f32 %v78_v24, %v33_v10 }
 0x13a   :  { %v58_v28 = vmul.f32 %v75_v25, %v49_v26 }
 0x13b   :  { %v80_v29 = vpop.eup %79 }
 0x13c   :  { %v67_v30 = vadd.f32 %v76_v27, %v58_v28  ;;  %v50_v31 = vmul.f32 %v80_v29, %v34_v14 }
 0x13e   :  { %69 = vst.msk [vmem:[%s140_s4] sm:$0xff] %vm23_vm0, %v67_v30  ;;  %v59_v32 = vmul.f32 %v75_v25, %v50_v31 }
 0x140   :  { %v68_v33 = vadd.f32 %v76_v27, %v59_v32 }
 0x142   :  { %70 = vst.msk [vmem:[%s140_s4 + $0x8] sm:$0xff] %vm23_vm0, %v68_v33 }

// kernel: transformer_forward.57
= control target key start
LH: loop header
LB: loop body
LE: loop exit
PB: predicated region body
PF: predicated region fallthrough
CT: control target
= control target key end

     0   :  { %s1411_s15 = smov 0   ;;  %s1413_s16 = smov 0   ;;  %s1563_s0 = inlined_call_operand.vmem [shape: f32[2,4,8,8], index: 0, kind: input, shape index: {}]   ;;  %s1564_s1 = inlined_call_operand.vmem [shape: f32[2,4,8,8], index: 1, kind: input, shape index: {}]   ;;  %s1565_s2 = inlined_call_operand.vmem [shape: f32[2,4,8,8], index: 2, kind: input, shape index: {}]   ;;  %s1566_s3 = inlined_call_operand.vmem [shape: f32[8,8], index: 3, kind: input, shape index: {}]   ;;  %s1567_s4 = inlined_call_operand.vmem [shape: f32[2,4,8,8], index: 4, kind: output, shape index: {}]  }
   0x1   :  { %s1415_s17 = smov 0  }
   0x2 LB: > { %s26_s18 = sadd.s32 1, %s1376_s16  ;;  %p1221_p0 = scmp.ge.s32.totalorder %s1380_s17, 1  ;;  %s1380_s17 = sphi %s1415_s17, %s14_s17   ;;  %s1376_s16 = sphi %s1413_s16, %s1569_s16   ;;  %s1372_s15 = sphi %s1411_s15, %s1568_s15  }
   0x3   : > { %p28_p1 = scmp.ge.s32.totalorder %s26_s18, 2  ;;  %p213_p2 = scmp.lt.s32.totalorder %s1380_s17, 3 }
   0x5   : > { %s1571_s18 = smov (%p28_p1, %s26_s18), 0  ;;  %p214_p3 = pnand %p1221_p0, %p213_p2 }
   0x6   : > { %p259_p4 = scmp.lt.s32.totalorder (!%p214_p3), %s1372_s15, 1  ;;  %vm302_vm0 = vcmask (!%p214_p3), 64512   ;;  %v1382_v0 = vmov (!%p214_p3), 0.0   ;;  %vm1383_vm1 = vmmov (!%p214_p3), 0   ;;  %vm293_vm2 = vcmask (!%p214_p3), 7168   ;;  %v628_v12 = vld [vmem:[%s1566_s3] sm:$0xff] (!%p214_p3) }
   0x7   : > { %217 = sbr.rel (%p214_p3) target bundleno = 832 (0x340), region = 36  ;;  %1264 = vmatprep.subr.mxu0 (!%p214_p3), %v1382_v0  ;;  %303 = vst.msk [vmem:[#allocation4] sm:$0xff] (!%p214_p3), %vm302_vm0, %v1382_v0  ;;  %304 = vst.msk [vmem:[#allocation4 + $0x8] sm:$0xff] (!%p214_p3), %vm302_vm0, %v1382_v0  ;;  %1266 = vmatprep.mubr.msk.f32.mxu0 (!%p214_p3), %vm1383_vm1, %v1382_v0  ;;  %v1384_v9 = vmov (!%p214_p3), -inf   ;;  %v1385_v31 = vmov (!%p214_p3), 0  }
   0x8   : > { %305 = vst.msk [vmem:[#allocation4 + $0x10] sm:$0xff] (!%p214_p3), %vm302_vm0, %v1382_v0  ;;  %306 = vst.msk [vmem:[#allocation4 + $0x18] sm:$0xff] (!%p214_p3), %vm302_vm0, %v1382_v0  ;;  %1269 = vmatprep.subr.mxu1 (!%p214_p3), %v1382_v0  ;;  %1271 = vmatprep.mubr.msk.f32.mxu1 (!%p214_p3), %vm1383_vm1, %v1382_v0 }
   0x9   : > { %294 = vst.msk [vmem:[#allocation2] sm:$0xff] (!%p214_p3), %vm293_vm2, %v1384_v9  ;;  %295 = vst.msk [vmem:[#allocation2 + $0x8] sm:$0xff] (!%p214_p3), %vm293_vm2, %v1384_v9  ;;  %1332 = vset.pattern.permute.xlu0 (!%p214_p3), %v1385_v31  ;;  %1333 = vset.pattern.permute.xlu1 (!%p214_p3), %v1385_v31 }
   0xa   : > { %296 = vst.msk [vmem:[#allocation2 + $0x10] sm:$0xff] (!%p214_p3), %vm293_vm2, %v1384_v9  ;;  %297 = vst.msk [vmem:[#allocation2 + $0x18] sm:$0xff] (!%p214_p3), %vm293_vm2, %v1384_v9 }
   0xb   : > { %298 = vst.msk [vmem:[#allocation3] sm:$0xff] (!%p214_p3), %vm293_vm2, %v1382_v0  ;;  %299 = vst.msk [vmem:[#allocation3 + $0x8] sm:$0xff] (!%p214_p3), %vm293_vm2, %v1382_v0 }
   0xc   : > { %300 = vst.msk [vmem:[#allocation3 + $0x10] sm:$0xff] (!%p214_p3), %vm293_vm2, %v1382_v0  ;;  %301 = vst.msk [vmem:[#allocation3 + $0x18] sm:$0xff] (!%p214_p3), %vm293_vm2, %v1382_v0 }
   0xe   : > { %s1573_s15 = smov (!%p259_p4, %s1372_s15), 1 }
   0xf   : > { %s1443_s19 = sshll.u32 %s1573_s15, 5 }
  0x10   : > { %s271_s22 = scalar_lea.vmem %s1564_s1, %s1443_s19  ;;  %s263_s25 = scalar_lea.vmem %s1563_s0, %s1443_s19  ;;  %v1492_v32 = vld [vmem:[#allocation2] sm:$0xff]  ;;  %v1497_v35 = vld [vmem:[#allocation2 + $0x8] sm:$0xff] }
  0x11   : > { %v311_v1 = vld [vmem:[%s271_s22] sm:$0xff]  ;;  %v312_v2 = vld [vmem:[%s271_s22 + $0x8] sm:$0xff]  ;;  %v313_v5 = vld [vmem:[%s271_s22 + $0x10] sm:$0xff]  ;;  %s279_s30 = scalar_lea.vmem %s1565_s2, %s1443_s19  ;;  %s288_s7 = scalar_lea.vmem %s1567_s4, %s1443_s19 }
  0x12   : > { %1265 = vmatpush3.xpose.msk.msra.mxu0 %vm302_vm0, %v311_v1  ;;  %v307_v3 = vld [vmem:[%s263_s25] sm:$0xff]  ;;  %1270 = vmatpush3.xpose.msk.msra.mxu1 %vm302_vm0, %v312_v2  ;;  %v308_v4 = vld [vmem:[%s263_s25 + $0x8] sm:$0xff]  ;;  %v314_v6 = vld [vmem:[%s271_s22 + $0x18] sm:$0xff] }
  0x13   : > { %1274 = vmatprep.subr.mxu0 %v1382_v0  ;;  %1279 = vmatprep.subr.mxu1 %v1382_v0  ;;  %v309_v7 = vld [vmem:[%s263_s25 + $0x10] sm:$0xff]  ;;  %v310_v8 = vld [vmem:[%s263_s25 + $0x18] sm:$0xff]  ;;  %v315_v48 = vld [vmem:[%s279_s30] sm:$0xff] }
  0x14   : > { %v1499_v36 = vld [vmem:[#allocation2 + $0x10] sm:$0xff]  ;;  %v1508_v42 = vld [vmem:[#allocation2 + $0x18] sm:$0xff]  ;;  %v316_v49 = vld [vmem:[%s279_s30 + $0x8] sm:$0xff] }
  0x15   : > { %1267 = vmatmul.mubr.msk.f32.vlgmr.msra.gmra.mrb[0].mxu0 %vm302_vm0, %v307_v3  ;;  %1272 = vmatmul.mubr.msk.f32.vlgmr.msra.gmra.mrb[0].mxu1 %vm302_vm0, %v308_v4  ;;  %v317_v61 = vld [vmem:[%s279_s30 + $0x10] sm:$0xff]  ;;  %v318_v2 = vld [vmem:[%s279_s30 + $0x18] sm:$0xff] }
  0x16   : > { %1275 = vmatpush3.xpose.msk.msra.mxu0 %vm302_vm0, %v313_v5  ;;  %1276 = vmatprep.mubr.msk.f32.mxu0 %vm1383_vm1, %v1382_v0 }
  0x17   : > { %1280 = vmatpush3.xpose.msk.msra.mxu1 %vm302_vm0, %v314_v6  ;;  %1281 = vmatprep.mubr.msk.f32.mxu1 %vm1383_vm1, %v1382_v0 }
  0x18   : > { %1284 = vmatprep.subr.mxu0 %v1382_v0  ;;  %1289 = vmatprep.subr.mxu1 %v1382_v0 }
  0x19   : > { %1277 = vmatmul.mubr.msk.f32.vlgmr.msra.gmra.mrb[2].mxu0 %vm302_vm0, %v309_v7 }
  0x1a   : > { %1282 = vmatmul.mubr.msk.f32.vlgmr.msra.gmra.mrb[2].mxu1 %vm302_vm0, %v310_v8  ;;  %1286 = vmatprep.mubr.msk.f32.mxu0 %vm1383_vm1, %v1382_v0 }
  0x1b   : > { %1291 = vmatprep.mubr.msk.f32.mxu1 %vm1383_vm1, %v1382_v0  ;;  %1285 = vmatpush3.msra.mxu0 %v315_v48 }
  0x1c   : > { %1294 = vmatprep.subr.mxu0 %v1382_v0  ;;  %1290 = vmatpush3.msra.mxu1 %v316_v49 }
  0x1d   : > { %1299 = vmatprep.subr.mxu1 %v1382_v0 }
  0xe8   : > { %v392_v10 = vpop.f32.mrb[0].mxu0  ;;  %v468_v11 = vpop.f32.mrb[0].mxu1 }
  0xe9   : > { %v624_v13 = vmul.f32 0.35355338, %v392_v10  ;;  %v1268_v14 = vpop.f32.mrb[1].mxu0  ;;  %v625_v15 = vmul.f32 0.35355338, %v468_v11  ;;  %v1273_v16 = vpop.f32.mrb[1].mxu1 }
  0xea   : > { %v697_v16 = vld [vmem:[#allocation3] sm:$0xff] }
  0xeb   : > { %v629_v17 = vadd.f32 %v628_v12, %v624_v13  ;;  %v630_v18 = vadd.f32 %v628_v12, %v625_v15 }
  0xec   : > { %v544_v19 = vpop.f32.mrb[2].mxu0 }
  0xed   : > { %v637_v20 = vsel %vm302_vm0, %v629_v17, -inf  ;;  %v626_v21 = vmul.f32 0.35355338, %v544_v19  ;;  %v1278_v22 = vpop.f32.mrb[3].mxu0  ;;  %v620_v23 = vpop.f32.mrb[2].mxu1  ;;  %v640_v26 = vsel %vm302_vm0, %v630_v18, -inf }
  0xee   : > { %638 = vmax.xlane.f32.xlu0 %v637_v20  ;;  %v627_v24 = vmul.f32 0.35355338, %v620_v23  ;;  %v1283_v25 = vpop.f32.mrb[3].mxu1  ;;  %v698_v19 = vld [vmem:[#allocation3 + $0x8] sm:$0xff]  ;;  %v699_v23 = vld [vmem:[#allocation3 + $0x10] sm:$0xff] }
  0xef   : > { %v631_v27 = vadd.f32 %v628_v12, %v626_v21 }
  0xf0   : > { %v632_v28 = vadd.f32 %v628_v12, %v627_v24 }
  0xf1   : > { %v643_v29 = vsel %vm302_vm0, %v631_v27, -inf }
  0xf2   : > { %641 = vmax.xlane.f32.xlu0 %v640_v26  ;;  %644 = vmax.xlane.f32.xlu1 %v643_v29  ;;  %v646_v30 = vsel %vm302_vm0, %v632_v28, -inf }
  0xf6   : > { %647 = vmax.xlane.f32.xlu1 %v646_v30 }
 0x17b   : > { %v639_v33 = vpop.xlane.xlu0 %638 }
 0x17c   : > { %v1495_v34 = vmax.f32 %v1492_v32, %v639_v33 }
 0x17e   : > { %v653_v37 = vsub.f32 %v1492_v32, %v1495_v34  ;;  %1054 = vst.msk [vmem:[#allocation2] sm:$0xff] %vm293_vm2, %v1495_v34  ;;  %667 = vperm.xlu0 %1332, %v1495_v34  }
 0x17f   : > { %v642_v38 = vpop.xlane.xlu0 %641  ;;  %v645_v39 = vpop.xlane.xlu1 %644 }
 0x180   : > { %v650_v40 = vmax.f32 %v1497_v35, %v642_v38  ;;  %v651_v41 = vmax.f32 %v1499_v36, %v645_v39  ;;  %v657_v10 = vmul.f32 1.442695, %v653_v37 }
 0x182   : > { %v654_v43 = vsub.f32 %v1497_v35, %v650_v40  ;;  %1055 = vst.msk [vmem:[#allocation2 + $0x8] sm:$0xff] %vm293_vm2, %v650_v40  ;;  %672 = vperm.xlu1 %1333, %v650_v40   ;;  %v655_v44 = vsub.f32 %v1499_v36, %v651_v41  ;;  %1056 = vst.msk [vmem:[#allocation2 + $0x10] sm:$0xff] %vm293_vm2, %v651_v41  ;;  %v726_v40 = vld [vmem:[#allocation4] sm:$0xff] }
 0x183   : > { %v648_v45 = vpop.xlane.xlu1 %647 }
 0x184   : > { %v652_v46 = vmax.f32 %v1508_v42, %v648_v45  ;;  %v659_v8 = vmul.f32 1.442695, %v654_v43  ;;  %v727_v43 = vld [vmem:[#allocation4 + $0x8] sm:$0xff] }
 0x186   : > { %677 = vperm.xlu1 %1333, %v651_v41   ;;  %v656_v47 = vsub.f32 %v1508_v42, %v652_v46  ;;  %1057 = vst.msk [vmem:[#allocation2 + $0x18] sm:$0xff] %vm293_vm2, %v652_v46 }
 0x188   : > { %v663_v11 = vmul.f32 1.442695, %v656_v47 }
 0x18a   : > { %682 = vperm.xlu1 %1333, %v652_v46  }
 0x1fd   : > { %v668_v50 = vpop.permute.xlu0 %667 }
 0x1fe   : > { %v685_v51 = vsub.f32 %v629_v17, %v668_v50  ;;  %v728_v50 = vld [vmem:[#allocation4 + $0x10] sm:$0xff] }
 0x200   : > { %v689_v52 = vmul.f32 1.442695, %v685_v51 }
 0x201   : > { %v673_v53 = vpop.permute.xlu1 %672 }
 0x202   : > { %1334 = vpow2.f32 %v689_v52  ;;  %v686_v54 = vsub.f32 %v630_v18, %v673_v53 }
 0x204   : > { %v691_v55 = vmul.f32 1.442695, %v686_v54 }
 0x205   : > { %v678_v56 = vpop.permute.xlu1 %677 }
 0x206   : > { %1336 = vpow2.f32 %v691_v55  ;;  %v687_v57 = vsub.f32 %v631_v27, %v678_v56  ;;  %v700_v27 = vld [vmem:[#allocation3 + $0x18] sm:$0xff] }
 0x207   : > { %v729_v55 = vld [vmem:[#allocation4 + $0x18] sm:$0xff] }
 0x208   : > { %v693_v58 = vmul.f32 1.442695, %v687_v57 }
 0x209   : > { %v683_v59 = vpop.permute.xlu1 %682 }
 0x20a   : > { %1338 = vpow2.f32 %v693_v58  ;;  %v688_v60 = vsub.f32 %v632_v28, %v683_v59 }
 0x20c   : > { %v1335_v62 = vpop.eup %1334  ;;  %v695_v63 = vmul.f32 1.442695, %v688_v60 }
 0x20d   : > { %1287 = vmatmul.mubr.msk.f32.vlgmr.msra.gmra.mrb[4].mxu0 %vm302_vm0, %v1335_v62  ;;  %v705_v1 = vsel %vm302_vm0, %v1335_v62, 0.0 }
 0x20e   : > { %1340 = vpow2.f32 %v695_v63  ;;  %706 = vadd.xlane.f32.xlu1 %v705_v1  ;;  %1295 = vmatpush3.msra.mxu0 %v317_v61 }
 0x20f   : > { %1296 = vmatprep.mubr.msk.f32.mxu0 %vm1383_vm1, %v1382_v0  ;;  %1342 = vpow2.f32 %v659_v8 }
 0x210   : > { %v1337_v3 = vpop.eup %1336  ;;  %1344 = vpow2.f32 %v657_v10 }
 0x211   : > { %1292 = vmatmul.mubr.msk.f32.vlgmr.msra.gmra.mrb[4].mxu1 %vm302_vm0, %v1337_v3  ;;  %v708_v4 = vsel %vm302_vm0, %v1337_v3, 0.0 }
 0x212   : > { %709 = vadd.xlane.f32.xlu0 %v708_v4  ;;  %1300 = vmatpush3.msra.mxu1 %v318_v2 }
 0x213   : > { %1301 = vmatprep.mubr.msk.f32.mxu1 %vm1383_vm1, %v1382_v0  ;;  %v661_v0 = vmul.f32 1.442695, %v655_v44 }
 0x214   : > { %v1339_v5 = vpop.eup %1338 }
 0x215   : > { %1297 = vmatmul.mubr.msk.f32.vlgmr.msra.gmra.mrb[6].mxu0 %vm302_vm0, %v1339_v5  ;;  %v711_v6 = vsel %vm302_vm0, %v1339_v5, 0.0  ;;  %1346 = vpow2.f32 %v661_v0 }
 0x216   : > { %712 = vadd.xlane.f32.xlu1 %v711_v6  ;;  %1348 = vpow2.f32 %v663_v11 }
 0x218   : > { %v1341_v7 = vpop.eup %1340 }
 0x219   : > { %1302 = vmatmul.mubr.msk.f32.vlgmr.msra.gmra.mrb[6].mxu1 %vm302_vm0, %v1341_v7  ;;  %v714_v9 = vsel %vm302_vm0, %v1341_v7, 0.0  ;;  %v1343_v12 = vpop.eup %1342 }
 0x21a   : > { %715 = vadd.xlane.f32.xlu1 %v714_v9  ;;  %v1345_v13 = vpop.eup %1344  ;;  %v702_v21 = vmul.f32 %v1343_v12, %v698_v19 }
 0x21b   : > { %v701_v17 = vmul.f32 %v1345_v13, %v697_v16 }
 0x21f   : > { %v1347_v14 = vpop.eup %1346 }
 0x220   : > { %v1349_v15 = vpop.eup %1348  ;;  %v703_v25 = vmul.f32 %v1347_v14, %v699_v23 }
 0x221   : > { %v704_v30 = vmul.f32 %v1349_v15, %v700_v27 }
 0x228   : > { %737 = vperm.xlu0 %1332, %v1343_v12  }
 0x22b   : > { %732 = vperm.xlu1 %1333, %v1345_v13  }
 0x22f   : > { %742 = vperm.xlu1 %1333, %v1347_v14  }
 0x233   : > { %747 = vperm.xlu1 %1333, %v1349_v15  }
 0x29b   : > { %v707_v18 = vpop.xlane.xlu1 %706 }
 0x29c   : > { %v717_v20 = vadd.f32 %v707_v18, %v701_v17 }
 0x29e   : > { %722 = vst.msk [vmem:[#allocation3] sm:$0xff] %vm293_vm2, %v717_v20 }
 0x29f   : > { %v710_v22 = vpop.xlane.xlu0 %709 }
 0x2a0   : > { %v718_v24 = vadd.f32 %v710_v22, %v702_v21 }
 0x2a2   : > { %723 = vst.msk [vmem:[#allocation3 + $0x8] sm:$0xff] %vm293_vm2, %v718_v24 }
 0x2a3   : > { %v713_v26 = vpop.xlane.xlu1 %712 }
 0x2a4   : > { %v719_v28 = vadd.f32 %v713_v26, %v703_v25 }
 0x2a5   : > { %v1065_v29 = vld [vmem:[#allocation3] sm:$0xff] }
 0x2a6   : > { %724 = vst.msk [vmem:[#allocation3 + $0x10] sm:$0xff] %vm293_vm2, %v719_v28  ;;  %1350 = vrcp.f32 %v1065_v29 }
 0x2a7   : > { %v716_v31 = vpop.xlane.xlu1 %715  ;;  %v738_v44 = vpop.permute.xlu0 %737 }
 0x2a8   : > { %v720_v32 = vadd.f32 %v716_v31, %v704_v30  ;;  %v751_v49 = vmul.f32 %v738_v44, %v727_v43 }
 0x2a9   : > { %v1066_v33 = vld [vmem:[#allocation3 + $0x8] sm:$0xff] }
 0x2aa   : > { %725 = vst.msk [vmem:[#allocation3 + $0x18] sm:$0xff] %vm293_vm2, %v720_v32  ;;  %1352 = vrcp.f32 %v1066_v33 }
 0x2ab   : > { %v733_v41 = vpop.permute.xlu1 %732 }
 0x2ac   : > { %v750_v42 = vmul.f32 %v733_v41, %v726_v40 }
 0x2ad   : > { %v1067_v34 = vld [vmem:[#allocation3 + $0x10] sm:$0xff] }
 0x2ae   : > { %1354 = vrcp.f32 %v1067_v34 }
 0x2af   : > { %v743_v48 = vpop.permute.xlu1 %742 }
 0x2b0   : > { %v1351_v35 = vpop.eup %1350  ;;  %v752_v54 = vmul.f32 %v743_v48, %v728_v50 }
 0x2b1   : > { %1075 = vperm.xlu1 %1333, %v1351_v35   ;;  %v1068_v36 = vld [vmem:[#allocation3 + $0x18] sm:$0xff] }
 0x2b2   : > { %1356 = vrcp.f32 %v1068_v36 }
 0x2b3   : > { %v748_v56 = vpop.permute.xlu1 %747 }
 0x2b4   : > { %v1353_v37 = vpop.eup %1352  ;;  %v753_v60 = vmul.f32 %v748_v56, %v729_v55 }
 0x2b5   : > { %1080 = vperm.xlu0 %1332, %v1353_v37  }
 0x2b8   : > { %v1355_v38 = vpop.eup %1354 }
 0x2b9   : > { %1085 = vperm.xlu1 %1333, %v1355_v38  }
 0x2bc   : > { %v1357_v39 = vpop.eup %1356 }
 0x2bd   : > { %1090 = vperm.xlu0 %1332, %v1357_v39  }
 0x2e0   : > { %v823_v45 = vpop.f32.mrb[4].mxu0 }
 0x2e1   : > { %v1046_v46 = vadd.f32 %v823_v45, %v750_v42  ;;  %v1288_v47 = vpop.f32.mrb[5].mxu0 }
 0x2e3   : > { %1050 = vst.msk [vmem:[#allocation4] sm:$0xff] %vm302_vm0, %v1046_v46 }
 0x2e4   : > { %v896_v51 = vpop.f32.mrb[4].mxu1 }
 0x2e5   : > { %v1047_v52 = vadd.f32 %v896_v51, %v751_v49  ;;  %v1293_v53 = vpop.f32.mrb[5].mxu1 }
 0x2e7   : > { %1051 = vst.msk [vmem:[#allocation4 + $0x8] sm:$0xff] %vm302_vm0, %v1047_v52 }
 0x2e8   : > { %v969_v57 = vpop.f32.mrb[6].mxu0 }
 0x2e9   : > { %v1048_v58 = vadd.f32 %v969_v57, %v752_v54  ;;  %v1298_v59 = vpop.f32.mrb[7].mxu0 }
 0x2ea   : > { %v1061_v2 = vld [vmem:[#allocation4] sm:$0xff] }
 0x2eb   : > { %1052 = vst.msk [vmem:[#allocation4 + $0x10] sm:$0xff] %vm302_vm0, %v1048_v58 }
 0x2ec   : > { %v1042_v61 = vpop.f32.mrb[6].mxu1 }
 0x2ed   : > { %v1049_v62 = vadd.f32 %v1042_v61, %v753_v60  ;;  %v1303_v63 = vpop.f32.mrb[7].mxu1 }
 0x2ee   : > { %v1062_v4 = vld [vmem:[#allocation4 + $0x8] sm:$0xff] }
 0x2ef   : > { %1053 = vst.msk [vmem:[#allocation4 + $0x18] sm:$0xff] %vm302_vm0, %v1049_v62 }
 0x2f2   : > { %v1063_v8 = vld [vmem:[#allocation4 + $0x10] sm:$0xff] }
 0x2f6   : > { %v1064_v0 = vld [vmem:[#allocation4 + $0x18] sm:$0xff] }
 0x330   : > { %v1076_v1 = vpop.permute.xlu1 %1075 }
 0x331   : > { %v1093_v3 = vmul.f32 %v1076_v1, %v1061_v2 }
 0x333   : > { %1097 = vst.msk [vmem:[%s288_s7] sm:$0xff] %vm302_vm0, %v1093_v3 }
 0x334   : > { %v1081_v5 = vpop.permute.xlu0 %1080 }
 0x335   : > { %v1094_v6 = vmul.f32 %v1081_v5, %v1062_v4 }
 0x337   : > { %1098 = vst.msk [vmem:[%s288_s7 + $0x8] sm:$0xff] %vm302_vm0, %v1094_v6 }
 0x338   : > { %v1086_v7 = vpop.permute.xlu1 %1085 }
 0x339   : > { %v1095_v9 = vmul.f32 %v1086_v7, %v1063_v8 }
 0x33b   : > { %1099 = vst.msk [vmem:[%s288_s7 + $0x10] sm:$0xff] %vm302_vm0, %v1095_v9 }
 0x33c   : > { %v1091_v10 = vpop.permute.xlu0 %1090 }
 0x33d   : > { %v1096_v11 = vmul.f32 %v1091_v10, %v1064_v0 }
 0x33f   : > { %1100 = vst.msk [vmem:[%s288_s7 + $0x18] sm:$0xff] %vm302_vm0, %v1096_v11 }
 0x340 PF: > { %s14_s17 = sadd.s32 1, %s1380_s17   ;;  %s1568_s15 = smov %s1376_s16 }
 0x341   : > { %p11_p5 = scmp.ge.s32.totalorder %s14_s17, 4   ;;  %s1569_s16 = smov %s1571_s18 }
 0x343   :  { %13 = sbr.rel (!%p11_p5) target bundleno = 2 (0x2), region = 83 }

// kernel: transformer_forward.45
= control target key start
LH: loop header
LB: loop body
LE: loop exit
PB: predicated region body
PF: predicated region fallthrough
CT: control target
= control target key end

     0   :  { %vm29_vm0 = vcmask 261120   ;;  %vm18_vm1 = vcmask 523264   ;;  %v167_v3 = vmov 0.0   ;;  %s223_s1 = inlined_call_operand.vmem [shape: f32[32,64], index: 1, kind: input, shape index: {}]   ;;  %s224_s0 = inlined_call_operand.vmem [shape: f32[16,32], index: 0, kind: input, shape index: {}]   ;;  %s225_s2 = inlined_call_operand.vmem [shape: f32[1,64], index: 2, kind: input, shape index: {}]   ;;  %s226_s3 = inlined_call_operand.vmem [shape: f32[16,64], index: 3, kind: output, shape index: {}]  }
   0x1   :  { %v25_v0 = vld [vmem:[%s223_s1] sm:$0xff]  ;;  %v26_v1 = vld [vmem:[%s223_s1 + $0x8] sm:$0xff]  ;;  %v27_v2 = vld [vmem:[%s223_s1 + $0x10] sm:$0xff]  ;;  %20 = vst.msk [vmem:[#allocation2 + $0x8] sm:$0xff] %vm18_vm1, %v167_v3 }
   0x2   :  { %19 = vst.msk [vmem:[#allocation2] sm:$0xff] %vm18_vm1, %v167_v3  ;;  %v158_v4 = vpack.c.bf16 %v26_v1, %v25_v0  ;;  %v28_v5 = vld [vmem:[%s223_s1 + $0x18] sm:$0xff]  ;;  %v23_v6 = vld [vmem:[%s224_s0] sm:$0xff]  ;;  %v24_v8 = vld [vmem:[%s224_s0 + $0x8] sm:$0xff] }
   0x3   :  { %v162_v7 = vpack.c.bf16 %v28_v5, %v27_v2  ;;  %155 = vmatprep.mubr.msk.f32.mxu0 %vm29_vm0, %v23_v6  ;;  %v140_v15 = vld [vmem:[%s225_s2] ss:$0 sm:$0xff] }
   0x4   :  { %159 = vmatprep.subr.bf16.mxu0 %v158_v4 }
   0x5   :  { %161 = vmatpush3.bf16.msra.mxu0 %v158_v4 }
   0x6   :  { %163 = vmatprep.subr.bf16.mxu0 %v162_v7 }
   0x8   :  { %v22_v9 = vld [vmem:[#allocation2 + $0x8] sm:$0xff] }
   0x9   :  { %165 = vmatpush3.bf16.msra.mxu0 %v162_v7  ;;  %v21_v10 = vld [vmem:[#allocation2] sm:$0xff] }
   0xc   :  { %156 = vmatmul.mubr.msk.f32.vlgmr.msra.gmra.mrb[0].mxu0 %vm29_vm0, %v24_v8 }
  0xdf   :  { %v157_v11 = vpop.f32.mrb[0].mxu0 }
  0xe0   :  { %v112_v12 = vadd.f32 %v157_v11, %v22_v9  ;;  %v102_v13 = vpop.f32.mrb[1].mxu0 }
  0xe1   :  { %v111_v14 = vadd.f32 %v102_v13, %v21_v10 }
  0xe2   :  { %115 = vst.msk [vmem:[#allocation2 + $0x8] sm:$0xff] %vm18_vm1, %v112_v12 }
  0xe3   :  { %114 = vst.msk [vmem:[#allocation2] sm:$0xff] %vm18_vm1, %v111_v14 }
  0xe9   :  { %v120_v16 = vld [vmem:[#allocation2 + $0x8] sm:$0xff] }
  0xea   :  { %v129_v17 = vadd.f32 %v140_v15, %v120_v16  ;;  %v119_v18 = vld [vmem:[#allocation2] sm:$0xff] }
  0xeb   :  { %v128_v19 = vadd.f32 %v140_v15, %v119_v18 }
  0xec   :  { %v131_v20 = vmax.f32 %v129_v17, 0.0 }
  0xed   :  { %v130_v21 = vmax.f32 %v128_v19, 0.0 }
  0xee   :  { %133 = vst.msk [vmem:[%s226_s3 + $0x8] sm:$0xff] %vm18_vm1, %v131_v20 }
  0xef   :  { %132 = vst.msk [vmem:[%s226_s3] sm:$0xff] %vm18_vm1, %v130_v21 }

// kernel: transformer_forward.46
= control target key start
LH: loop header
LB: loop body
LE: loop exit
PB: predicated region body
PF: predicated region fallthrough
CT: control target
= control target key end

     0   :  { %vm18_vm0 = vcmask 261120   ;;  %vm33_vm1 = vcmask 523264   ;;  %v189_v3 = vmov 0.0   ;;  %s257_s1 = inlined_call_operand.vmem [shape: f32[64,32], index: 1, kind: input, shape index: {}]   ;;  %s258_s0 = inlined_call_operand.vmem [shape: f32[16,64], index: 0, kind: input, shape index: {}]   ;;  %s259_s2 = inlined_call_operand.vmem [shape: f32[1,32], index: 2, kind: input, shape index: {}]   ;;  %s260_s3 = inlined_call_operand.vmem [shape: f32[16,32], index: 3, kind: output, shape index: {}]  }
   0x1   :  { %v25_v0 = vld [vmem:[%s257_s1] sm:$0xff]  ;;  %v26_v1 = vld [vmem:[%s257_s1 + $0x8] sm:$0xff]  ;;  %v27_v2 = vld [vmem:[%s257_s1 + $0x10] sm:$0xff]  ;;  %20 = vst.msk [vmem:[#allocation2 + $0x8] sm:$0xff] %vm18_vm0, %v189_v3 }
   0x2   :  { %19 = vst.msk [vmem:[#allocation2] sm:$0xff] %vm18_vm0, %v189_v3  ;;  %v172_v4 = vpack.c.bf16 %v26_v1, %v25_v0  ;;  %v28_v5 = vld [vmem:[%s257_s1 + $0x18] sm:$0xff]  ;;  %v29_v7 = vld [vmem:[%s257_s1 + $0x20] sm:$0xff]  ;;  %v30_v8 = vld [vmem:[%s257_s1 + $0x28] sm:$0xff] }
   0x3   :  { %v176_v6 = vpack.c.bf16 %v28_v5, %v27_v2  ;;  %v23_v9 = vld [vmem:[%s258_s0] sm:$0xff]  ;;  %v180_v10 = vpack.c.bf16 %v30_v8, %v29_v7  ;;  %v31_v11 = vld [vmem:[%s257_s1 + $0x30] sm:$0xff]  ;;  %v32_v12 = vld [vmem:[%s257_s1 + $0x38] sm:$0xff] }
   0x4   :  { %173 = vmatprep.subr.bf16.mxu0 %v172_v4  ;;  %169 = vmatprep.mubr.msk.f32.mxu0 %vm33_vm1, %v23_v9  ;;  %v184_v13 = vpack.c.bf16 %v32_v12, %v31_v11  ;;  %v24_v14 = vld [vmem:[%s258_s0 + $0x8] sm:$0xff]  ;;  %v142_v21 = vld [vmem:[%s259_s2] ss:$0 sm:$0xff] }
   0x5   :  { %175 = vmatpush3.bf16.msra.mxu0 %v172_v4 }
   0x6   :  { %177 = vmatprep.subr.bf16.mxu0 %v176_v6 }
   0x8   :  { %v22_v15 = vld [vmem:[#allocation2 + $0x8] sm:$0xff] }
   0x9   :  { %179 = vmatpush3.bf16.msra.mxu0 %v176_v6  ;;  %v21_v16 = vld [vmem:[#allocation2] sm:$0xff] }
   0xa   :  { %181 = vmatprep.subr.bf16.mxu0 %v180_v10 }
   0xd   :  { %183 = vmatpush3.bf16.msra.mxu0 %v180_v10 }
   0xe   :  { %185 = vmatprep.subr.bf16.mxu0 %v184_v13 }
  0x11   :  { %187 = vmatpush3.bf16.msra.mxu0 %v184_v13 }
  0x14   :  { %170 = vmatmul.mubr.msk.f32.vlgmr.msra.gmra.mrb[0].mxu0 %vm33_vm1, %v24_v14 }
  0xe7   :  { %v171_v17 = vpop.f32.mrb[0].mxu0 }
  0xe8   :  { %v116_v18 = vadd.f32 %v171_v17, %v22_v15  ;;  %v106_v19 = vpop.f32.mrb[1].mxu0 }
  0xe9   :  { %v115_v20 = vadd.f32 %v106_v19, %v21_v16 }
  0xea   :  { %119 = vst.msk [vmem:[#allocation2 + $0x8] sm:$0xff] %vm18_vm0, %v116_v18 }
  0xeb   :  { %118 = vst.msk [vmem:[#allocation2] sm:$0xff] %vm18_vm0, %v115_v20 }
  0xf1   :  { %v124_v22 = vld [vmem:[#allocation2 + $0x8] sm:$0xff] }
  0xf2   :  { %v133_v23 = vadd.f32 %v142_v21, %v124_v22  ;;  %v123_v24 = vld [vmem:[#allocation2] sm:$0xff] }
  0xf3   :  { %v132_v25 = vadd.f32 %v142_v21, %v123_v24 }
  0xf4   :  { %135 = vst.msk [vmem:[%s260_s3 + $0x8] sm:$0xff] %vm18_vm0, %v133_v23 }
  0xf5   :  { %134 = vst.msk [vmem:[%s260_s3] sm:$0xff] %vm18_vm0, %v132_v25 }

// kernel: transformer_forward.55
= control target key start
LH: loop header
LB: loop body
LE: loop exit
PB: predicated region body
PF: predicated region fallthrough
CT: control target
= control target key end

     0   :  { %vm16_vm0 = vcmask 261120   ;;  %s118_s0 = inlined_call_operand.vmem [shape: f32[16,32], index: 0, kind: input, shape index: {}]   ;;  %s119_s1 = inlined_call_operand.vmem [shape: f32[1,32], index: 1, kind: input, shape index: {}]   ;;  %s120_s2 = inlined_call_operand.vmem [shape: f32[1,32], index: 2, kind: input, shape index: {}]   ;;  %s121_s3 = inlined_call_operand.vmem [shape: f32[16,32], index: 3, kind: output, shape index: {}]  }
   0x1   :  { %v14_v0 = vld [vmem:[%s118_s0] sm:$0xff]  ;;  %v15_v1 = vld [vmem:[%s118_s0 + $0x8] sm:$0xff] }
   0x2   :  { %v17_v2 = vsel %vm16_vm0, %v14_v0, 0.0  ;;  %v20_v3 = vsel %vm16_vm0, %v15_v1, 0.0  ;;  %v68_v21 = vld [vmem:[%s119_s1] ss:$0 sm:$0xff] }
   0x3   :  { %18 = vadd.xlane.f32.xlu0 %v17_v2  ;;  %v69_v23 = vld [vmem:[%s120_s2] ss:$0 sm:$0xff] }
   0x7   :  { %21 = vadd.xlane.f32.xlu0 %v20_v3 }
  0x90   :  { %v19_v4 = vpop.xlane.xlu0 %18 }
  0x91   :  { %v24_v5 = vmul.f32 0.03125, %v19_v4 }
  0x93   :  { %v26_v6 = vsub.f32 %v14_v0, %v24_v5 }
  0x94   :  { %v22_v7 = vpop.xlane.xlu0 %21 }
  0x95   :  { %v25_v8 = vmul.f32 0.03125, %v22_v7  ;;  %v28_v9 = vmul.f32 %v26_v6, %v26_v6 }
  0x97   :  { %v27_v10 = vsub.f32 %v15_v1, %v25_v8  ;;  %v30_v11 = vsel %vm16_vm0, %v28_v9, 0.0 }
  0x98   :  { %31 = vadd.xlane.f32.xlu1 %v30_v11 }
  0x99   :  { %v29_v12 = vmul.f32 %v27_v10, %v27_v10 }
  0x9b   :  { %v33_v13 = vsel %vm16_vm0, %v29_v12, 0.0 }
  0x9c   :  { %34 = vadd.xlane.f32.xlu1 %v33_v13 }
 0x125   :  { %v32_v14 = vpop.xlane.xlu1 %31 }
 0x126   :  { %v36_v15 = vmul.f32 0.03125, %v32_v14 }
 0x128   :  { %v38_v16 = vadd.f32 1e-05, %v36_v15 }
 0x129   :  { %v35_v17 = vpop.xlane.xlu1 %34 }
 0x12a   :  { %70 = vrsqrt.f32 %v38_v16  ;;  %v37_v18 = vmul.f32 0.03125, %v35_v17 }
 0x12c   :  { %v39_v19 = vadd.f32 1e-05, %v37_v18 }
 0x12e   :  { %72 = vrsqrt.f32 %v39_v19 }
 0x134   :  { %v71_v20 = vpop.eup %70 }
 0x135   :  { %v42_v22 = vmul.f32 %v71_v20, %v26_v6 }
 0x137   :  { %v51_v24 = vmul.f32 %v68_v21, %v42_v22 }
 0x138   :  { %v73_v25 = vpop.eup %72 }
 0x139   :  { %v60_v26 = vadd.f32 %v69_v23, %v51_v24  ;;  %v43_v27 = vmul.f32 %v73_v25, %v27_v10 }
 0x13b   :  { %62 = vst.msk [vmem:[%s121_s3] sm:$0xff] %vm16_vm0, %v60_v26  ;;  %v52_v28 = vmul.f32 %v68_v21, %v43_v27 }
 0x13d   :  { %v61_v29 = vadd.f32 %v69_v23, %v52_v28 }
 0x13f   :  { %63 = vst.msk [vmem:[%s121_s3 + $0x8] sm:$0xff] %vm16_vm0, %v61_v29 }

// kernel: transformer_forward.42
= control target key start
LH: loop header
LB: loop body
LE: loop exit
PB: predicated region body
PF: predicated region fallthrough
CT: control target
= control target key end

     0   :  { %s1340_s12 = smov 0   ;;  %s1342_s13 = smov 0   ;;  %s1489_s0 = inlined_call_operand.vmem [shape: f32[2,4,8,8], index: 0, kind: input, shape index: {}]   ;;  %s1490_s1 = inlined_call_operand.vmem [shape: f32[2,4,8,8], index: 1, kind: input, shape index: {}]   ;;  %s1491_s2 = inlined_call_operand.vmem [shape: f32[2,4,8,8], index: 2, kind: input, shape index: {}]   ;;  %s1492_s3 = inlined_call_operand.vmem [shape: f32[2,4,8,8], index: 3, kind: output, shape index: {}]  }
   0x1   :  { %s1344_s14 = smov 0  }
   0x2 LB: > { %s25_s15 = sadd.s32 1, %s1310_s13  ;;  %p1155_p0 = scmp.ge.s32.totalorder %s1314_s14, 1  ;;  %s1314_s14 = sphi %s1344_s14, %s13_s14   ;;  %s1310_s13 = sphi %s1342_s13, %s1494_s13   ;;  %s1306_s12 = sphi %s1340_s12, %s1493_s12  }
   0x3   : > { %p27_p1 = scmp.ge.s32.totalorder %s25_s15, 2  ;;  %p179_p2 = scmp.lt.s32.totalorder %s1314_s14, 3 }
   0x5   : > { %s1496_s15 = smov (%p27_p1, %s25_s15), 0  ;;  %p180_p3 = pnand %p1155_p0, %p179_p2 }
   0x6   : > { %p219_p4 = scmp.lt.s32.totalorder (!%p180_p3), %s1306_s12, 1  ;;  %vm258_vm0 = vcmask (!%p180_p3), 64512   ;;  %v1316_v0 = vmov (!%p180_p3), 0.0   ;;  %vm1317_vm1 = vmmov (!%p180_p3), 0   ;;  %vm249_vm2 = vcmask (!%p180_p3), 7168  }
   0x7   : > { %183 = sbr.rel (%p180_p3) target bundleno = 830 (0x33e), region = 32  ;;  %1198 = vmatprep.subr.mxu0 (!%p180_p3), %v1316_v0  ;;  %259 = vst.msk [vmem:[#allocation4] sm:$0xff] (!%p180_p3), %vm258_vm0, %v1316_v0  ;;  %260 = vst.msk [vmem:[#allocation4 + $0x8] sm:$0xff] (!%p180_p3), %vm258_vm0, %v1316_v0  ;;  %1200 = vmatprep.mubr.msk.f32.mxu0 (!%p180_p3), %vm1317_vm1, %v1316_v0  ;;  %v1318_v9 = vmov (!%p180_p3), -inf   ;;  %v1319_v26 = vmov (!%p180_p3), 0  }
   0x8   : > { %261 = vst.msk [vmem:[#allocation4 + $0x10] sm:$0xff] (!%p180_p3), %vm258_vm0, %v1316_v0  ;;  %262 = vst.msk [vmem:[#allocation4 + $0x18] sm:$0xff] (!%p180_p3), %vm258_vm0, %v1316_v0  ;;  %1203 = vmatprep.subr.mxu1 (!%p180_p3), %v1316_v0  ;;  %1205 = vmatprep.mubr.msk.f32.mxu1 (!%p180_p3), %vm1317_vm1, %v1316_v0 }
   0x9   : > { %250 = vst.msk [vmem:[#allocation2] sm:$0xff] (!%p180_p3), %vm249_vm2, %v1318_v9  ;;  %251 = vst.msk [vmem:[#allocation2 + $0x8] sm:$0xff] (!%p180_p3), %vm249_vm2, %v1318_v9  ;;  %1266 = vset.pattern.permute.xlu0 (!%p180_p3), %v1319_v26  ;;  %1267 = vset.pattern.permute.xlu1 (!%p180_p3), %v1319_v26 }
   0xa   : > { %252 = vst.msk [vmem:[#allocation2 + $0x10] sm:$0xff] (!%p180_p3), %vm249_vm2, %v1318_v9  ;;  %253 = vst.msk [vmem:[#allocation2 + $0x18] sm:$0xff] (!%p180_p3), %vm249_vm2, %v1318_v9 }
   0xb   : > { %254 = vst.msk [vmem:[#allocation3] sm:$0xff] (!%p180_p3), %vm249_vm2, %v1316_v0  ;;  %255 = vst.msk [vmem:[#allocation3 + $0x8] sm:$0xff] (!%p180_p3), %vm249_vm2, %v1316_v0 }
   0xc   : > { %256 = vst.msk [vmem:[#allocation3 + $0x10] sm:$0xff] (!%p180_p3), %vm249_vm2, %v1316_v0  ;;  %257 = vst.msk [vmem:[#allocation3 + $0x18] sm:$0xff] (!%p180_p3), %vm249_vm2, %v1316_v0 }
   0xe   : > { %s1498_s12 = smov (!%p219_p4, %s1306_s12), 1 }
   0xf   : > { %s1372_s16 = sshll.u32 %s1498_s12, 5 }
  0x10   : > { %s231_s19 = scalar_lea.vmem %s1490_s1, %s1372_s16  ;;  %s223_s22 = scalar_lea.vmem %s1489_s0, %s1372_s16  ;;  %v1418_v27 = vld [vmem:[#allocation2] sm:$0xff]  ;;  %v1423_v30 = vld [vmem:[#allocation2 + $0x8] sm:$0xff] }
  0x11   : > { %v267_v1 = vld [vmem:[%s231_s19] sm:$0xff]  ;;  %v268_v2 = vld [vmem:[%s231_s19 + $0x8] sm:$0xff]  ;;  %v269_v5 = vld [vmem:[%s231_s19 + $0x10] sm:$0xff]  ;;  %s239_s25 = scalar_lea.vmem %s1491_s2, %s1372_s16  ;;  %s244_s28 = scalar_lea.vmem %s1492_s3, %s1372_s16 }
  0x12   : > { %1199 = vmatpush3.xpose.msk.msra.mxu0 %vm258_vm0, %v267_v1  ;;  %v263_v3 = vld [vmem:[%s223_s22] sm:$0xff]  ;;  %1204 = vmatpush3.xpose.msk.msra.mxu1 %vm258_vm0, %v268_v2  ;;  %v264_v4 = vld [vmem:[%s223_s22 + $0x8] sm:$0xff]  ;;  %v270_v6 = vld [vmem:[%s231_s19 + $0x18] sm:$0xff] }
  0x13   : > { %1208 = vmatprep.subr.mxu0 %v1316_v0  ;;  %1213 = vmatprep.subr.mxu1 %v1316_v0  ;;  %v265_v7 = vld [vmem:[%s223_s22 + $0x10] sm:$0xff]  ;;  %v266_v8 = vld [vmem:[%s223_s22 + $0x18] sm:$0xff]  ;;  %v271_v43 = vld [vmem:[%s239_s25] sm:$0xff] }
  0x14   : > { %v1425_v31 = vld [vmem:[#allocation2 + $0x10] sm:$0xff]  ;;  %v1434_v37 = vld [vmem:[#allocation2 + $0x18] sm:$0xff]  ;;  %v272_v44 = vld [vmem:[%s239_s25 + $0x8] sm:$0xff] }
  0x15   : > { %1201 = vmatmul.mubr.msk.f32.vlgmr.msra.gmra.mrb[0].mxu0 %vm258_vm0, %v263_v3  ;;  %1206 = vmatmul.mubr.msk.f32.vlgmr.msra.gmra.mrb[0].mxu1 %vm258_vm0, %v264_v4  ;;  %v273_v56 = vld [vmem:[%s239_s25 + $0x10] sm:$0xff]  ;;  %v274_v60 = vld [vmem:[%s239_s25 + $0x18] sm:$0xff] }
  0x16   : > { %1209 = vmatpush3.xpose.msk.msra.mxu0 %vm258_vm0, %v269_v5  ;;  %1210 = vmatprep.mubr.msk.f32.mxu0 %vm1317_vm1, %v1316_v0 }
  0x17   : > { %1214 = vmatpush3.xpose.msk.msra.mxu1 %vm258_vm0, %v270_v6  ;;  %1215 = vmatprep.mubr.msk.f32.mxu1 %vm1317_vm1, %v1316_v0 }
  0x18   : > { %1218 = vmatprep.subr.mxu0 %v1316_v0  ;;  %1223 = vmatprep.subr.mxu1 %v1316_v0 }
  0x19   : > { %1211 = vmatmul.mubr.msk.f32.vlgmr.msra.gmra.mrb[2].mxu0 %vm258_vm0, %v265_v7 }
  0x1a   : > { %1216 = vmatmul.mubr.msk.f32.vlgmr.msra.gmra.mrb[2].mxu1 %vm258_vm0, %v266_v8  ;;  %1220 = vmatprep.mubr.msk.f32.mxu0 %vm1317_vm1, %v1316_v0 }
  0x1b   : > { %1225 = vmatprep.mubr.msk.f32.mxu1 %vm1317_vm1, %v1316_v0  ;;  %1219 = vmatpush3.msra.mxu0 %v271_v43 }
  0x1c   : > { %1228 = vmatprep.subr.mxu0 %v1316_v0  ;;  %1224 = vmatpush3.msra.mxu1 %v272_v44 }
  0x1d   : > { %1233 = vmatprep.subr.mxu1 %v1316_v0 }
  0xe8   : > { %v348_v10 = vpop.f32.mrb[0].mxu0  ;;  %v424_v11 = vpop.f32.mrb[0].mxu1 }
  0xe9   : > { %v580_v12 = vmul.f32 0.35355338, %v348_v10  ;;  %v1202_v13 = vpop.f32.mrb[1].mxu0  ;;  %v581_v14 = vmul.f32 0.35355338, %v424_v11  ;;  %v1207_v15 = vpop.f32.mrb[1].mxu1 }
  0xea   : > { %v648_v11 = vld [vmem:[#allocation3] sm:$0xff] }
  0xeb   : > { %v588_v16 = vsel %vm258_vm0, %v580_v12, -inf  ;;  %v591_v19 = vsel %vm258_vm0, %v581_v14, -inf }
  0xec   : > { %589 = vmax.xlane.f32.xlu0 %v588_v16  ;;  %v500_v17 = vpop.f32.mrb[2].mxu0 }
  0xed   : > { %v582_v18 = vmul.f32 0.35355338, %v500_v17  ;;  %v1212_v20 = vpop.f32.mrb[3].mxu0  ;;  %v576_v21 = vpop.f32.mrb[2].mxu1 }
  0xee   : > { %v583_v22 = vmul.f32 0.35355338, %v576_v21  ;;  %v1217_v23 = vpop.f32.mrb[3].mxu1 }
  0xef   : > { %v594_v24 = vsel %vm258_vm0, %v582_v18, -inf }
  0xf0   : > { %592 = vmax.xlane.f32.xlu0 %v591_v19  ;;  %595 = vmax.xlane.f32.xlu1 %v594_v24  ;;  %v597_v25 = vsel %vm258_vm0, %v583_v22, -inf }
  0xf4   : > { %598 = vmax.xlane.f32.xlu1 %v597_v25 }
 0x179   : > { %v590_v28 = vpop.xlane.xlu0 %589 }
 0x17a   : > { %v1421_v29 = vmax.f32 %v1418_v27, %v590_v28 }
 0x17c   : > { %v604_v32 = vsub.f32 %v1418_v27, %v1421_v29  ;;  %1005 = vst.msk [vmem:[#allocation2] sm:$0xff] %vm249_vm2, %v1421_v29  ;;  %618 = vperm.xlu0 %1266, %v1421_v29  }
 0x17d   : > { %v593_v33 = vpop.xlane.xlu0 %592  ;;  %v596_v34 = vpop.xlane.xlu1 %595 }
 0x17e   : > { %v601_v35 = vmax.f32 %v1423_v30, %v593_v33  ;;  %v602_v36 = vmax.f32 %v1425_v31, %v596_v34  ;;  %v608_v5 = vmul.f32 1.442695, %v604_v32 }
 0x180   : > { %v605_v38 = vsub.f32 %v1423_v30, %v601_v35  ;;  %1006 = vst.msk [vmem:[#allocation2 + $0x8] sm:$0xff] %vm249_vm2, %v601_v35  ;;  %623 = vperm.xlu1 %1267, %v601_v35   ;;  %v606_v39 = vsub.f32 %v1425_v31, %v602_v36  ;;  %1007 = vst.msk [vmem:[#allocation2 + $0x10] sm:$0xff] %vm249_vm2, %v602_v36  ;;  %v677_v35 = vld [vmem:[#allocation4] sm:$0xff] }
 0x181   : > { %v599_v40 = vpop.xlane.xlu1 %598 }
 0x182   : > { %v603_v41 = vmax.f32 %v1434_v37, %v599_v40  ;;  %v610_v3 = vmul.f32 1.442695, %v605_v38  ;;  %v678_v38 = vld [vmem:[#allocation4 + $0x8] sm:$0xff] }
 0x184   : > { %628 = vperm.xlu1 %1267, %v602_v36   ;;  %v607_v42 = vsub.f32 %v1434_v37, %v603_v41  ;;  %1008 = vst.msk [vmem:[#allocation2 + $0x18] sm:$0xff] %vm249_vm2, %v603_v41 }
 0x186   : > { %v614_v6 = vmul.f32 1.442695, %v607_v42 }
 0x188   : > { %633 = vperm.xlu1 %1267, %v603_v41  }
 0x1fb   : > { %v619_v45 = vpop.permute.xlu0 %618 }
 0x1fc   : > { %v636_v46 = vsub.f32 %v580_v12, %v619_v45  ;;  %v679_v45 = vld [vmem:[#allocation4 + $0x10] sm:$0xff] }
 0x1fe   : > { %v640_v47 = vmul.f32 1.442695, %v636_v46 }
 0x1ff   : > { %v624_v48 = vpop.permute.xlu1 %623 }
 0x200   : > { %1268 = vpow2.f32 %v640_v47  ;;  %v637_v49 = vsub.f32 %v581_v14, %v624_v48  ;;  %v649_v14 = vld [vmem:[#allocation3 + $0x8] sm:$0xff] }
 0x202   : > { %v642_v50 = vmul.f32 1.442695, %v637_v49 }
 0x203   : > { %v629_v51 = vpop.permute.xlu1 %628 }
 0x204   : > { %1270 = vpow2.f32 %v642_v50  ;;  %v638_v52 = vsub.f32 %v582_v18, %v629_v51  ;;  %v650_v18 = vld [vmem:[#allocation3 + $0x10] sm:$0xff]  ;;  %v680_v50 = vld [vmem:[#allocation4 + $0x18] sm:$0xff] }
 0x206   : > { %v644_v53 = vmul.f32 1.442695, %v638_v52 }
 0x207   : > { %v634_v54 = vpop.permute.xlu1 %633 }
 0x208   : > { %1272 = vpow2.f32 %v644_v53  ;;  %v639_v55 = vsub.f32 %v583_v22, %v634_v54  ;;  %v651_v22 = vld [vmem:[#allocation3 + $0x18] sm:$0xff] }
 0x20a   : > { %v1269_v57 = vpop.eup %1268  ;;  %v646_v58 = vmul.f32 1.442695, %v639_v55 }
 0x20b   : > { %1221 = vmatmul.mubr.msk.f32.vlgmr.msra.gmra.mrb[4].mxu0 %vm258_vm0, %v1269_v57  ;;  %v656_v59 = vsel %vm258_vm0, %v1269_v57, 0.0 }
 0x20c   : > { %1274 = vpow2.f32 %v646_v58  ;;  %657 = vadd.xlane.f32.xlu1 %v656_v59  ;;  %1229 = vmatpush3.msra.mxu0 %v273_v56 }
 0x20d   : > { %1230 = vmatprep.mubr.msk.f32.mxu0 %vm1317_vm1, %v1316_v0  ;;  %1276 = vpow2.f32 %v610_v3 }
 0x20e   : > { %v1271_v61 = vpop.eup %1270  ;;  %1278 = vpow2.f32 %v608_v5 }
 0x20f   : > { %1226 = vmatmul.mubr.msk.f32.vlgmr.msra.gmra.mrb[4].mxu1 %vm258_vm0, %v1271_v61  ;;  %v659_v62 = vsel %vm258_vm0, %v1271_v61, 0.0 }
 0x210   : > { %660 = vadd.xlane.f32.xlu0 %v659_v62  ;;  %1234 = vmatpush3.msra.mxu1 %v274_v60 }
 0x211   : > { %1235 = vmatprep.mubr.msk.f32.mxu1 %vm1317_vm1, %v1316_v0  ;;  %v612_v0 = vmul.f32 1.442695, %v606_v39 }
 0x212   : > { %v1273_v63 = vpop.eup %1272 }
 0x213   : > { %1231 = vmatmul.mubr.msk.f32.vlgmr.msra.gmra.mrb[6].mxu0 %vm258_vm0, %v1273_v63  ;;  %v662_v1 = vsel %vm258_vm0, %v1273_v63, 0.0  ;;  %1280 = vpow2.f32 %v612_v0 }
 0x214   : > { %663 = vadd.xlane.f32.xlu1 %v662_v1  ;;  %1282 = vpow2.f32 %v614_v6 }
 0x216   : > { %v1275_v2 = vpop.eup %1274 }
 0x217   : > { %1236 = vmatmul.mubr.msk.f32.vlgmr.msra.gmra.mrb[6].mxu1 %vm258_vm0, %v1275_v2  ;;  %v665_v4 = vsel %vm258_vm0, %v1275_v2, 0.0  ;;  %v1277_v7 = vpop.eup %1276 }
 0x218   : > { %666 = vadd.xlane.f32.xlu1 %v665_v4  ;;  %v1279_v8 = vpop.eup %1278  ;;  %v653_v16 = vmul.f32 %v1277_v7, %v649_v14 }
 0x219   : > { %v652_v12 = vmul.f32 %v1279_v8, %v648_v11 }
 0x21d   : > { %v1281_v9 = vpop.eup %1280 }
 0x21e   : > { %v1283_v10 = vpop.eup %1282  ;;  %v654_v20 = vmul.f32 %v1281_v9, %v650_v18 }
 0x21f   : > { %v655_v25 = vmul.f32 %v1283_v10, %v651_v22 }
 0x226   : > { %688 = vperm.xlu0 %1266, %v1277_v7  }
 0x229   : > { %683 = vperm.xlu1 %1267, %v1279_v8  }
 0x22d   : > { %693 = vperm.xlu1 %1267, %v1281_v9  }
 0x231   : > { %698 = vperm.xlu1 %1267, %v1283_v10  }
 0x299   : > { %v658_v13 = vpop.xlane.xlu1 %657 }
 0x29a   : > { %v668_v15 = vadd.f32 %v658_v13, %v652_v12 }
 0x29c   : > { %673 = vst.msk [vmem:[#allocation3] sm:$0xff] %vm249_vm2, %v668_v15 }
 0x29d   : > { %v661_v17 = vpop.xlane.xlu0 %660 }
 0x29e   : > { %v669_v19 = vadd.f32 %v661_v17, %v653_v16 }
 0x2a0   : > { %674 = vst.msk [vmem:[#allocation3 + $0x8] sm:$0xff] %vm249_vm2, %v669_v19 }
 0x2a1   : > { %v664_v21 = vpop.xlane.xlu1 %663 }
 0x2a2   : > { %v670_v23 = vadd.f32 %v664_v21, %v654_v20 }
 0x2a3   : > { %v1016_v24 = vld [vmem:[#allocation3] sm:$0xff] }
 0x2a4   : > { %675 = vst.msk [vmem:[#allocation3 + $0x10] sm:$0xff] %vm249_vm2, %v670_v23  ;;  %1284 = vrcp.f32 %v1016_v24 }
 0x2a5   : > { %v667_v26 = vpop.xlane.xlu1 %666  ;;  %v689_v39 = vpop.permute.xlu0 %688 }
 0x2a6   : > { %v671_v27 = vadd.f32 %v667_v26, %v655_v25  ;;  %v702_v44 = vmul.f32 %v689_v39, %v678_v38 }
 0x2a7   : > { %v1017_v28 = vld [vmem:[#allocation3 + $0x8] sm:$0xff] }
 0x2a8   : > { %676 = vst.msk [vmem:[#allocation3 + $0x18] sm:$0xff] %vm249_vm2, %v671_v27  ;;  %1286 = vrcp.f32 %v1017_v28 }
 0x2a9   : > { %v684_v36 = vpop.permute.xlu1 %683 }
 0x2aa   : > { %v701_v37 = vmul.f32 %v684_v36, %v677_v35 }
 0x2ab   : > { %v1018_v29 = vld [vmem:[#allocation3 + $0x10] sm:$0xff] }
 0x2ac   : > { %1288 = vrcp.f32 %v1018_v29 }
 0x2ad   : > { %v694_v43 = vpop.permute.xlu1 %693 }
 0x2ae   : > { %v1285_v30 = vpop.eup %1284  ;;  %v703_v49 = vmul.f32 %v694_v43, %v679_v45 }
 0x2af   : > { %1026 = vperm.xlu1 %1267, %v1285_v30   ;;  %v1019_v31 = vld [vmem:[#allocation3 + $0x18] sm:$0xff] }
 0x2b0   : > { %1290 = vrcp.f32 %v1019_v31 }
 0x2b1   : > { %v699_v51 = vpop.permute.xlu1 %698 }
 0x2b2   : > { %v1287_v32 = vpop.eup %1286  ;;  %v704_v55 = vmul.f32 %v699_v51, %v680_v50 }
 0x2b3   : > { %1031 = vperm.xlu0 %1266, %v1287_v32  }
 0x2b6   : > { %v1289_v33 = vpop.eup %1288 }
 0x2b7   : > { %1036 = vperm.xlu1 %1267, %v1289_v33  }
 0x2ba   : > { %v1291_v34 = vpop.eup %1290 }
 0x2bb   : > { %1041 = vperm.xlu0 %1266, %v1291_v34  }
 0x2de   : > { %v774_v40 = vpop.f32.mrb[4].mxu0 }
 0x2df   : > { %v997_v41 = vadd.f32 %v774_v40, %v701_v37  ;;  %v1222_v42 = vpop.f32.mrb[5].mxu0 }
 0x2e1   : > { %1001 = vst.msk [vmem:[#allocation4] sm:$0xff] %vm258_vm0, %v997_v41 }
 0x2e2   : > { %v847_v46 = vpop.f32.mrb[4].mxu1 }
 0x2e3   : > { %v998_v47 = vadd.f32 %v847_v46, %v702_v44  ;;  %v1227_v48 = vpop.f32.mrb[5].mxu1 }
 0x2e5   : > { %1002 = vst.msk [vmem:[#allocation4 + $0x8] sm:$0xff] %vm258_vm0, %v998_v47 }
 0x2e6   : > { %v920_v52 = vpop.f32.mrb[6].mxu0 }
 0x2e7   : > { %v999_v53 = vadd.f32 %v920_v52, %v703_v49  ;;  %v1232_v54 = vpop.f32.mrb[7].mxu0 }
 0x2e8   : > { %v1012_v60 = vld [vmem:[#allocation4] sm:$0xff] }
 0x2e9   : > { %1003 = vst.msk [vmem:[#allocation4 + $0x10] sm:$0xff] %vm258_vm0, %v999_v53 }
 0x2ea   : > { %v993_v56 = vpop.f32.mrb[6].mxu1 }
 0x2eb   : > { %v1000_v57 = vadd.f32 %v993_v56, %v704_v55  ;;  %v1237_v58 = vpop.f32.mrb[7].mxu1 }
 0x2ec   : > { %v1013_v62 = vld [vmem:[#allocation4 + $0x8] sm:$0xff] }
 0x2ed   : > { %1004 = vst.msk [vmem:[#allocation4 + $0x18] sm:$0xff] %vm258_vm0, %v1000_v57 }
 0x2f0   : > { %v1014_v3 = vld [vmem:[#allocation4 + $0x10] sm:$0xff] }
 0x2f4   : > { %v1015_v0 = vld [vmem:[#allocation4 + $0x18] sm:$0xff] }
 0x32e   : > { %v1027_v59 = vpop.permute.xlu1 %1026 }
 0x32f   : > { %v1044_v61 = vmul.f32 %v1027_v59, %v1012_v60 }
 0x331   : > { %1048 = vst.msk [vmem:[%s244_s28] sm:$0xff] %vm258_vm0, %v1044_v61 }
 0x332   : > { %v1032_v63 = vpop.permute.xlu0 %1031 }
 0x333   : > { %v1045_v1 = vmul.f32 %v1032_v63, %v1013_v62 }
 0x335   : > { %1049 = vst.msk [vmem:[%s244_s28 + $0x8] sm:$0xff] %vm258_vm0, %v1045_v1 }
 0x336   : > { %v1037_v2 = vpop.permute.xlu1 %1036 }
 0x337   : > { %v1046_v4 = vmul.f32 %v1037_v2, %v1014_v3 }
 0x339   : > { %1050 = vst.msk [vmem:[%s244_s28 + $0x10] sm:$0xff] %vm258_vm0, %v1046_v4 }
 0x33a   : > { %v1042_v5 = vpop.permute.xlu0 %1041 }
 0x33b   : > { %v1047_v6 = vmul.f32 %v1042_v5, %v1015_v0 }
 0x33d   : > { %1051 = vst.msk [vmem:[%s244_s28 + $0x18] sm:$0xff] %vm258_vm0, %v1047_v6 }
 0x33e PF: > { %s13_s14 = sadd.s32 1, %s1314_s14   ;;  %s1493_s12 = smov %s1310_s13 }
 0x33f   : > { %p10_p5 = scmp.ge.s32.totalorder %s13_s14, 4   ;;  %s1494_s13 = smov %s1496_s15 }
 0x341   :  { %12 = sbr.rel (!%p10_p5) target bundleno = 2 (0x2), region = 76 }

// kernel: transformer_forward.61
= control target key start
LH: loop header
LB: loop body
LE: loop exit
PB: predicated region body
PF: predicated region fallthrough
CT: control target
= control target key end

     0   :  { %vm29_vm0 = vcmask 261120   ;;  %vm18_vm1 = vcmask 523264   ;;  %v165_v3 = vmov 0.0   ;;  %s221_s1 = inlined_call_operand.vmem [shape: f32[32,64], index: 1, kind: input, shape index: {}]   ;;  %s222_s0 = inlined_call_operand.vmem [shape: f32[16,32], index: 0, kind: input, shape index: {}]   ;;  %s223_s2 = inlined_call_operand.vmem [shape: f32[1,64], index: 2, kind: input, shape index: {}]   ;;  %s224_s3 = inlined_call_operand.vmem [shape: f32[16,64], index: 3, kind: output, shape index: {}]  }
   0x1   :  { %v25_v0 = vld [vmem:[%s221_s1] sm:$0xff]  ;;  %v26_v1 = vld [vmem:[%s221_s1 + $0x8] sm:$0xff]  ;;  %v27_v2 = vld [vmem:[%s221_s1 + $0x10] sm:$0xff]  ;;  %20 = vst.msk [vmem:[#allocation2 + $0x8] sm:$0xff] %vm18_vm1, %v165_v3 }
   0x2   :  { %19 = vst.msk [vmem:[#allocation2] sm:$0xff] %vm18_vm1, %v165_v3  ;;  %v156_v4 = vpack.c.bf16 %v26_v1, %v25_v0  ;;  %v28_v5 = vld [vmem:[%s221_s1 + $0x18] sm:$0xff]  ;;  %v23_v6 = vld [vmem:[%s222_s0] sm:$0xff]  ;;  %v24_v8 = vld [vmem:[%s222_s0 + $0x8] sm:$0xff] }
   0x3   :  { %v160_v7 = vpack.c.bf16 %v28_v5, %v27_v2  ;;  %153 = vmatprep.mubr.msk.f32.mxu0 %vm29_vm0, %v23_v6  ;;  %v138_v15 = vld [vmem:[%s223_s2] ss:$0 sm:$0xff] }
   0x4   :  { %157 = vmatprep.subr.bf16.mxu0 %v156_v4 }
   0x5   :  { %159 = vmatpush3.bf16.msra.mxu0 %v156_v4 }
   0x6   :  { %161 = vmatprep.subr.bf16.mxu0 %v160_v7 }
   0x8   :  { %v22_v9 = vld [vmem:[#allocation2 + $0x8] sm:$0xff] }
   0x9   :  { %163 = vmatpush3.bf16.msra.mxu0 %v160_v7  ;;  %v21_v10 = vld [vmem:[#allocation2] sm:$0xff] }
   0xc   :  { %154 = vmatmul.mubr.msk.f32.vlgmr.msra.gmra.mrb[0].mxu0 %vm29_vm0, %v24_v8 }
  0xdf   :  { %v155_v11 = vpop.f32.mrb[0].mxu0 }
  0xe0   :  { %v112_v12 = vadd.f32 %v155_v11, %v22_v9  ;;  %v102_v13 = vpop.f32.mrb[1].mxu0 }
  0xe1   :  { %v111_v14 = vadd.f32 %v102_v13, %v21_v10 }
  0xe2   :  { %115 = vst.msk [vmem:[#allocation2 + $0x8] sm:$0xff] %vm18_vm1, %v112_v12 }
  0xe3   :  { %114 = vst.msk [vmem:[#allocation2] sm:$0xff] %vm18_vm1, %v111_v14 }
  0xe9   :  { %v120_v16 = vld [vmem:[#allocation2 + $0x8] sm:$0xff] }
  0xea   :  { %v129_v17 = vadd.f32 %v138_v15, %v120_v16  ;;  %v119_v18 = vld [vmem:[#allocation2] sm:$0xff] }
  0xeb   :  { %v128_v19 = vadd.f32 %v138_v15, %v119_v18 }
  0xec   :  { %131 = vst.msk [vmem:[%s224_s3 + $0x8] sm:$0xff] %vm18_vm1, %v129_v17 }
  0xed   :  { %130 = vst.msk [vmem:[%s224_s3] sm:$0xff] %vm18_vm1, %v128_v19 }

// kernel: transformer_forward.81
= control target key start
LH: loop header
LB: loop body
LE: loop exit
PB: predicated region body
PF: predicated region fallthrough
CT: control target
= control target key end

     0   :  { %vm30_vm0 = vcmask 261120   ;;  %vm19_vm1 = vcmask 130048   ;;  %v205_v6 = vmov 0.0   ;;  %s270_s0 = inlined_call_operand.vmem [shape: f32[16,32], index: 0, kind: input, shape index: {}]   ;;  %s271_s1 = inlined_call_operand.vmem [shape: f32[32,16], index: 1, kind: input, shape index: {}]   ;;  %s272_s2 = inlined_call_operand.vmem [shape: f32[1,16], index: 2, kind: input, shape index: {}]   ;;  %s273_s3 = inlined_call_operand.hbm [shape: f32[16,16], index: 3, kind: output, shape index: {}]  }
   0x1   :  { %v26_v0 = vld [vmem:[%s271_s1] sm:$0xff]  ;;  %v27_v1 = vld [vmem:[%s271_s1 + $0x8] sm:$0xff]  ;;  %v28_v2 = vld [vmem:[%s271_s1 + $0x10] sm:$0xff]  ;;  %21 = vst.msk [vmem:[#allocation2 + $0x8] sm:$0xff] %vm19_vm1, %v205_v6 }
   0x2   :  { %v169_v3 = vpack.c.bf16 %v27_v1, %v26_v0  ;;  %v29_v4 = vld [vmem:[%s271_s1 + $0x18] sm:$0xff]  ;;  %v24_v5 = vld [vmem:[%s270_s0] sm:$0xff]  ;;  %20 = vst.msk [vmem:[#allocation2] sm:$0xff] %vm19_vm1, %v205_v6 }
   0x3   :  { %v173_v7 = vpack.c.bf16 %v29_v4, %v28_v2  ;;  %166 = vmatprep.mubr.msk.f32.mxu0 %vm30_vm0, %v24_v5 }
   0x4   :  { %8 = vsyncpa [#allocation4], 0  ;;  %170 = vmatprep.subr.bf16.mxu0 %v169_v3  ;;  %v25_v8 = vld [vmem:[%s270_s0 + $0x8] sm:$0xff]  ;;  %v151_v15 = vld [vmem:[%s272_s2] ss:$0 sm:$0xff]  ;;  %s206_s25 = smov [#allocation3]  }
   0x5   :  { %172 = vmatpush3.bf16.msra.mxu0 %v169_v3  ;;  %s138_s26 = sshll.u32 %s206_s25, 4  ;;  %s139_s26 = int_to_ptr.vmem [resolvable:$true] %s138_s26 }
   0x6   :  { %174 = vmatprep.subr.bf16.mxu0 %v173_v7  ;;  %s181_s0 = scalar_lea.vmem %s139_s26, 256  ;;  %p186_p1 = scmp.lt.s32.totalorder %s139_s26, %s139_s26 }
   0x7   :  { %p182_p0 = scmp.ne.s32.totalorder %s139_s26, %s181_s0  ;;  %p187_p2 = scmp.lt.s32.totalorder %s181_s0, %s181_s0 }
   0x8   :  { %v23_v9 = vld [vmem:[#allocation2 + $0x8] sm:$0xff] }
   0x9   :  { %176 = vmatpush3.bf16.msra.mxu0 %v173_v7  ;;  %v22_v10 = vld [vmem:[#allocation2] sm:$0xff]  ;;  %p188_p3 = por %p187_p2, %p186_p1 }
   0xb   :  { %p189_p4 = pnand %p188_p3, %p182_p0 }
   0xc   :  { %167 = vmatmul.mubr.msk.f32.vlgmr.msra.gmra.mrb[0].mxu0 %vm30_vm0, %v25_v8 }
  0xdf   :  { %v168_v11 = vpop.f32.mrb[0].mxu0 }
  0xe0   :  { %v113_v12 = vadd.f32 %v168_v11, %v23_v9  ;;  %v103_v13 = vpop.f32.mrb[1].mxu0 }
  0xe1   :  { %v112_v14 = vadd.f32 %v103_v13, %v22_v10 }
  0xe2   :  { %116 = vst.msk [vmem:[#allocation2 + $0x8] sm:$0xff] %vm19_vm1, %v113_v12 }
  0xe3   :  { %115 = vst.msk [vmem:[#allocation2] sm:$0xff] %vm19_vm1, %v112_v14 }
  0xe9   :  { %v121_v16 = vld [vmem:[#allocation2 + $0x8] sm:$0xff] }
  0xea   :  { %v120_v17 = vld [vmem:[#allocation2] sm:$0xff]  ;;  %v130_v18 = vadd.f32 %v151_v15, %v121_v16 }
  0xeb   :  { %v129_v19 = vadd.f32 %v151_v15, %v120_v17 }
  0xec   :  { %132 = vst.msk [vmem:[#allocation3 + $0x8] sm:$0xff] %vm19_vm1, %v130_v18 }
  0xed   :  { %131 = vst.msk [vmem:[#allocation3] sm:$0xff] %vm19_vm1, %v129_v19 }
  0xee   :  { %192 = shalt.err (!%p189_p4)
}
  0xef   :  { %s193_s28 = scalar_lea.hbm %s273_s3, 256 }
  0xf0   :  { %p194_p5 = scmp.ne.s32.totalorder %s273_s3, %s193_s28  ;;  %p197_p6 = scmp.lt.u32.totalorder %s193_s28, %s273_s3 }
  0xf2   :  { %p199_p7 = pnand %p197_p6, %p194_p5 }
  0xf4   :  { %202 = shalt.err (!%p199_p7)
}
  0xf5   :  { %s207_s6 = smov 128   ;;  %s208_s7 = smov 8  }
  0xf6   :  { %144 = dma.vmem_to_hbm [thread:$0]  %s139_s26, 256, %s273_s3, [#allocation4], %s207_s6, %s207_s6, %s208_s7  }
  0xf7   :  { %203 = dma.done.wait [#allocation4], 256  }
  0xf8   :  { %204 = vsyncadd [#allocation4], 4294967040 }
  0xf9   :  { %148 = vsyncpa [#allocation4], 1 }

</bundles_post_ra>
